<compile_context>
chip_gen: v5e
topology: v5e:2x2
jax: 0.10.0
libtpu: 0.0.40
codegen_flags: <defaults>
</compile_context>

<pallas_src>
import math
from functools import partial

import jax
import jax.numpy as jnp
from jax.experimental import pallas as pl
from jax.experimental.pallas import tpu as pltpu


def _conv_pool_kernel(x_ref, w2_ref, shift_ref, pooled_ref, *, row_tile):
    """Grid: (batch_blocks, row_tiles); the row-tile axis is the reduction.

    x_ref:      (blk, H+2, W+2, Cin)  zero-padded NHWC tile (mxu dtype);
                constant block index along the row-tile axis -> DMAed once per
                batch block and kept resident in VMEM.
    w2_ref:     (9*Cin, F)            im2col conv weights, BN scale folded in
    shift_ref:  (1, F)                folded conv bias + BN shift (f32)
    pooled_ref: (blk, F)              f32 running spatial SUM (resident output)
    """
    j = pl.program_id(1)
    blk, hp, wp, cin = x_ref.shape
    w = wp - 2
    th = row_tile
    f = w2_ref.shape[-1]

    r0 = pl.multiple_of(j * th, th)          # first output row of this tile

    # im2col: pack the 9 conv taps of this row tile into one (blk*th*W, 9*Cin)
    # LHS and run a single K = 9*Cin MXU matmul (vs. nine K=Cin matmuls).
    taps = []
    for dh in range(3):
        for dw in range(3):
            taps.append(
                x_ref[:, pl.ds(r0 + dh, th), dw:dw + w, :]
                .reshape(blk * th * w, cin))
    patches = jnp.concatenate(taps, axis=-1)                 # (blk*th*W, 9*Cin)
    acc = jnp.dot(patches, w2_ref[...],
                  preferred_element_type=jnp.float32)        # (blk*th*W, F)

    # Folded conv-bias + BatchNorm3d (inference) shift, then ReLU — in f32.
    y = jnp.maximum(acc + shift_ref[...], 0.0)

    # Partial AdaptiveAvgPool3d(1): spatial SUM for this row tile (the 1/(H*W)
    # scale is folded into the classifier weight on the host).
    part = jnp.sum(y.reshape(blk, th * w, f), axis=1)        # (blk, F)

    @pl.when(j == 0)
    def _():
        pooled_ref[...] = jnp.zeros_like(pooled_ref)

    pooled_ref[...] += part


def _classifier_kernel(p_ref, cw_ref, cb_ref, out_ref):
    """Grid: (batch_blocks,).  One (blk, F) x (F, NCp) MXU matmul per step.

    p_ref:   (blk, F)    f32 pooled spatial SUM
    cw_ref:  (F, NCp)    classifier weight pre-scaled by 1/(H*W), lane-padded
    cb_ref:  (1, NCp)    classifier bias (padded, f32)
    out_ref: (blk, NCp)  f32 logits
    """
    logits = jnp.dot(p_ref[...].astype(cw_ref.dtype), cw_ref[...],
                     preferred_element_type=jnp.float32) + cb_ref[...]
    out_ref[...] = logits.astype(out_ref.dtype)


def _largest_divisor_leq(n, target):
    t = max(1, min(target, n))
    while n % t:
        t -= 1
    return t


def v3d_forward(x_nchw, conv_w, conv_b, bn_scale, bn_shift, cls_w, cls_b,
                *, block_n=8, row_tile=8, mxu_dtype=jnp.float32,
                vmem_limit_bytes=48 * 1024 * 1024):
    n, c, h, w = x_nchw.shape
    f = conv_w.shape[-1]
    nc = cls_w.shape[-1]

    # ---- host-side folding / layout prep ----------------------------------
    # Fold BatchNorm (inference) + conv bias into the conv weight and a shift:
    #   (conv(x, W) + b) * s + t  ==  conv(x, W*s) + (b*s + t)
    # then reshape the folded weight to im2col layout (9*Cin, F).
    w2 = (conv_w * bn_scale).reshape(9 * c, f).astype(mxu_dtype)
    shift = (conv_b * bn_scale + bn_shift).reshape(1, f).astype(jnp.float32)

    # Classifier: fold the 1/(H*W) pooling scale into the weight (kernel 1
    # accumulates a plain spatial SUM) and zero-pad num_classes to a multiple
    # of 128 lanes so the logits store is an unmasked full-lane vst.
    nc_pad = pl.cdiv(nc, 128) * 128
    cw_pad = jnp.zeros((f, nc_pad), mxu_dtype).at[:, :nc].set(
        (cls_w / float(h * w)).astype(mxu_dtype))
    cb_pad = jnp.zeros((1, nc_pad), jnp.float32).at[:, :nc].set(
        cls_b.astype(jnp.float32))

    # Batch blocking (>= 2 batch steps when N allows it feeds both v7x TCs).
    blk = block_n if n >= block_n else n
    n_pad = pl.cdiv(n, blk) * blk

    # Row tiling of the conv output (reduction axis of the pooled sum).
    th = _largest_divisor_leq(h, row_tile)
    n_row_tiles = h // th

    # NCHW -> NHWC, SAME-pad H/W for the 3x3 kernel, pad batch, cast to the
    # MXU operand dtype — one fused host pass over x.
    x = jnp.transpose(x_nchw, (0, 2, 3, 1))
    x = jnp.pad(x, ((0, n_pad - n), (1, 1), (1, 1), (0, 0)))
    x = x.astype(mxu_dtype)

    # ---- kernel 1: conv + folded BN + ReLU + global average pool (sum) ----
    pooled = pl.pallas_call(
        partial(_conv_pool_kernel, row_tile=th),
        out_shape=jax.ShapeDtypeStruct((n_pad, f), jnp.float32),
        grid_spec=pltpu.PrefetchScalarGridSpec(
            num_scalar_prefetch=0,
            grid=(n_pad // blk, n_row_tiles),
            in_specs=[
                # x: constant block index along the row-tile axis -> fetched
                # once per batch block; weights/shift resident throughout.
                pl.BlockSpec((blk, h + 2, w + 2, c),
                             lambda i, j: (i, 0, 0, 0)),
                pl.BlockSpec((9 * c, f), lambda i, j: (0, 0)),
                pl.BlockSpec((1, f), lambda i, j: (0, 0)),
            ],
            out_specs=pl.BlockSpec((blk, f), lambda i, j: (i, 0)),
        ),
        compiler_params=pltpu.CompilerParams(
            dimension_semantics=("parallel", "arbitrary"),
            vmem_limit_bytes=vmem_limit_bytes),
    )(x, w2, shift)

    # ---- kernel 2: classifier Linear(F, num_classes) over the whole batch --
    out = pl.pallas_call(
        _classifier_kernel,
        out_shape=jax.ShapeDtypeStruct((n_pad, nc_pad), jnp.float32),
        grid_spec=pltpu.PrefetchScalarGridSpec(
            num_scalar_prefetch=0,
            grid=(n_pad // blk,),
            in_specs=[
                pl.BlockSpec((blk, f), lambda i: (i, 0)),
                pl.BlockSpec((f, nc_pad), lambda i: (0, 0)),
                pl.BlockSpec((1, nc_pad), lambda i: (0, 0)),
            ],
            out_specs=pl.BlockSpec((blk, nc_pad), lambda i: (i, 0)),
        ),
        compiler_params=pltpu.CompilerParams(
            dimension_semantics=("parallel",),
            vmem_limit_bytes=vmem_limit_bytes),
    )(pooled, cw_pad, cb_pad)

    return out[:n, :nc]   # (N, num_classes)


def reference_forward(x_nchw, conv_w, conv_b, bn_scale, bn_shift, cls_w, cls_b):
    x = jnp.transpose(x_nchw, (0, 2, 3, 1))
    y = jax.lax.conv_general_dilated(
        x, conv_w, window_strides=(1, 1), padding='SAME',
        dimension_numbers=('NHWC', 'HWIO', 'NHWC'))
    y = y + conv_b
    y = y * bn_scale + bn_shift
    y = jnp.maximum(y, 0.0)
    pooled = jnp.mean(y, axis=(1, 2))
    return pooled @ cls_w + cls_b


if __name__ == "__main__":
    # Small, module-consistent shapes.
    N, C, H, W = 2, 4, 16, 16          # input images (NCHW, like PyTorch)
    F = 32                             # num_features (512 in the real model)
    NUM_CLASSES = 10                   # num_classes  (1000 in the real model)

    key = jax.random.PRNGKey(0)
    k_conv, k_clsw, k_clsb, k_x = jax.random.split(key, 4)

    # Conv3d weight, kernel (1,3,3): kaiming_normal_(mode='fan_out', relu),
    # matching V3D.init_weights for pretrained=False.  The temporal dim
    # (size 1) is folded away -> stored as (3, 3, Cin, F).
    fan_out = F * 1 * 3 * 3
    conv_w = jax.random.normal(k_conv, (3, 3, C, F), jnp.float32) * math.sqrt(
        2.0 / fan_out)
    conv_b = jnp.zeros((F,), jnp.float32)

    # BatchNorm3d: gamma=1, beta=0 (per init_weights), running stats 0/1, eval.
    eps = 1e-5
    bn_scale = jnp.full((F,), 1.0 / math.sqrt(1.0 + eps), jnp.float32)
    bn_shift = jnp.zeros((F,), jnp.float32)

    # Classifier Linear(F, num_classes), default PyTorch uniform init.
    bound = 1.0 / math.sqrt(F)
    cls_w = jax.random.uniform(k_clsw, (F, NUM_CLASSES), jnp.float32,
                               -bound, bound)
    cls_b = jax.random.uniform(k_clsb, (NUM_CLASSES,), jnp.float32,
                               -bound, bound)

    x = jax.random.normal(k_x, (N, C, H, W), jnp.float32)

    ref = jax.block_until_ready(
        reference_forward(x, conv_w, conv_b, bn_scale, bn_shift, cls_w, cls_b))

    # f32 MXU operands: strict numerical check.
    out = jax.block_until_ready(
        v3d_forward(x, conv_w, conv_b, bn_scale, bn_shift, cls_w, cls_b,
                    mxu_dtype=jnp.float32))
    assert out.shape == (N, NUM_CLASSES), out.shape
    assert jnp.allclose(out, ref, rtol=1e-5, atol=1e-5), (
        "f32 mismatch vs reference: max abs err "
        f"{float(jnp.max(jnp.abs(out - ref)))}")

    # bf16 MXU operands (recommended on v6e/v7x): loose-tolerance smoke test.
    out_bf16 = jax.block_until_ready(
        v3d_forward(x, conv_w, conv_b, bn_scale, bn_shift, cls_w, cls_b,
                    mxu_dtype=jnp.bfloat16))
    assert out_bf16.shape == (N, NUM_CLASSES), out_bf16.shape
    assert float(jnp.max(jnp.abs(out_bf16 - ref))) < 5e-2, (
        "bf16 mismatch vs reference: max abs err "
        f"{float(jnp.max(jnp.abs(out_bf16 - ref)))}")

    print("KERNEL_OK")
</pallas_src>

<mosaic_0001>
module attributes {stable_mosaic.version = 11 : i64} {
  func.func @_conv_pool_kernel(%arg0: i32, %arg1: i32, %arg2: memref<2x18x18x4xf32, #tpu.memory_space<vmem>>, %arg3: memref<36x32xf32, #tpu.memory_space<vmem>>, %arg4: memref<1x32xf32, #tpu.memory_space<vmem>>, %arg5: memref<2x32xf32, #tpu.memory_space<vmem>>) attributes {dimension_semantics = [#tpu.dimension_semantics<parallel>, #tpu.dimension_semantics<arbitrary>], iteration_bounds = array<i64: 1, 2>, scalar_prefetch = 0 : i64, scratch_operands = 0 : i64, tpu.core_type = #tpu.core_type<tc>, window_params = [{transform_indices = @transform_0, window_bounds = array<i64: 2, 18, 18, 4>}, {pipeline_mode = #tpu.pipeline_mode<synchronous>, transform_indices = @transform_1, window_bounds = array<i64: 36, 32>}, {pipeline_mode = #tpu.pipeline_mode<synchronous>, transform_indices = @transform_2, window_bounds = array<i64: 1, 32>}, {transform_indices = @transform_3, window_bounds = array<i64: 2, 32>}]} {
    %c8_i32 = arith.constant 8 : i32
    %0 = arith.muli %arg1, %c8_i32 : i32
    %1 = tpu.assume_multiple %0, 8 : i32
    %c0_i32 = arith.constant 0 : i32
    %2 = arith.addi %1, %c0_i32 : i32
    %c0 = arith.constant 0 : index
    %3 = arith.index_cast %2 : i32 to index
    %c0_0 = arith.constant 0 : index
    %c0_1 = arith.constant 0 : index
    %4 = vector.load %arg2[%c0, %3, %c0_0, %c0_1] : memref<2x18x18x4xf32, #tpu.memory_space<vmem>>, vector<2x8x16x4xf32>
    %5 = vector.shape_cast %4 : vector<2x8x16x4xf32> to vector<256x4xf32>
    %c0_i32_2 = arith.constant 0 : i32
    %6 = arith.addi %1, %c0_i32_2 : i32
    %c0_3 = arith.constant 0 : index
    %7 = arith.index_cast %6 : i32 to index
    %c1 = arith.constant 1 : index
    %c0_4 = arith.constant 0 : index
    %8 = vector.load %arg2[%c0_3, %7, %c1, %c0_4] : memref<2x18x18x4xf32, #tpu.memory_space<vmem>>, vector<2x8x16x4xf32>
    %9 = vector.shape_cast %8 : vector<2x8x16x4xf32> to vector<256x4xf32>
    %c0_i32_5 = arith.constant 0 : i32
    %10 = arith.addi %1, %c0_i32_5 : i32
    %c0_6 = arith.constant 0 : index
    %11 = arith.index_cast %10 : i32 to index
    %c2 = arith.constant 2 : index
    %c0_7 = arith.constant 0 : index
    %12 = vector.load %arg2[%c0_6, %11, %c2, %c0_7] : memref<2x18x18x4xf32, #tpu.memory_space<vmem>>, vector<2x8x16x4xf32>
    %13 = vector.shape_cast %12 : vector<2x8x16x4xf32> to vector<256x4xf32>
    %c1_i32 = arith.constant 1 : i32
    %14 = arith.addi %1, %c1_i32 : i32
    %c0_8 = arith.constant 0 : index
    %15 = arith.index_cast %14 : i32 to index
    %c0_9 = arith.constant 0 : index
    %c0_10 = arith.constant 0 : index
    %16 = vector.load %arg2[%c0_8, %15, %c0_9, %c0_10] : memref<2x18x18x4xf32, #tpu.memory_space<vmem>>, vector<2x8x16x4xf32>
    %17 = vector.shape_cast %16 : vector<2x8x16x4xf32> to vector<256x4xf32>
    %c1_i32_11 = arith.constant 1 : i32
    %18 = arith.addi %1, %c1_i32_11 : i32
    %c0_12 = arith.constant 0 : index
    %19 = arith.index_cast %18 : i32 to index
    %c1_13 = arith.constant 1 : index
    %c0_14 = arith.constant 0 : index
    %20 = vector.load %arg2[%c0_12, %19, %c1_13, %c0_14] : memref<2x18x18x4xf32, #tpu.memory_space<vmem>>, vector<2x8x16x4xf32>
    %21 = vector.shape_cast %20 : vector<2x8x16x4xf32> to vector<256x4xf32>
    %c1_i32_15 = arith.constant 1 : i32
    %22 = arith.addi %1, %c1_i32_15 : i32
    %c0_16 = arith.constant 0 : index
    %23 = arith.index_cast %22 : i32 to index
    %c2_17 = arith.constant 2 : index
    %c0_18 = arith.constant 0 : index
    %24 = vector.load %arg2[%c0_16, %23, %c2_17, %c0_18] : memref<2x18x18x4xf32, #tpu.memory_space<vmem>>, vector<2x8x16x4xf32>
    %25 = vector.shape_cast %24 : vector<2x8x16x4xf32> to vector<256x4xf32>
    %c2_i32 = arith.constant 2 : i32
    %26 = arith.addi %1, %c2_i32 : i32
    %c0_19 = arith.constant 0 : index
    %27 = arith.index_cast %26 : i32 to index
    %c0_20 = arith.constant 0 : index
    %c0_21 = arith.constant 0 : index
    %28 = vector.load %arg2[%c0_19, %27, %c0_20, %c0_21] : memref<2x18x18x4xf32, #tpu.memory_space<vmem>>, vector<2x8x16x4xf32>
    %29 = vector.shape_cast %28 : vector<2x8x16x4xf32> to vector<256x4xf32>
    %c2_i32_22 = arith.constant 2 : i32
    %30 = arith.addi %1, %c2_i32_22 : i32
    %c0_23 = arith.constant 0 : index
    %31 = arith.index_cast %30 : i32 to index
    %c1_24 = arith.constant 1 : index
    %c0_25 = arith.constant 0 : index
    %32 = vector.load %arg2[%c0_23, %31, %c1_24, %c0_25] : memref<2x18x18x4xf32, #tpu.memory_space<vmem>>, vector<2x8x16x4xf32>
    %33 = vector.shape_cast %32 : vector<2x8x16x4xf32> to vector<256x4xf32>
    %c2_i32_26 = arith.constant 2 : i32
    %34 = arith.addi %1, %c2_i32_26 : i32
    %c0_27 = arith.constant 0 : index
    %35 = arith.index_cast %34 : i32 to index
    %c2_28 = arith.constant 2 : index
    %c0_29 = arith.constant 0 : index
    %36 = vector.load %arg2[%c0_27, %35, %c2_28, %c0_29] : memref<2x18x18x4xf32, #tpu.memory_space<vmem>>, vector<2x8x16x4xf32>
    %37 = vector.shape_cast %36 : vector<2x8x16x4xf32> to vector<256x4xf32>
    %38 = tpu.concatenate %5, %9, %13, %17, %21, %25, %29, %33, %37 in 1 : vector<256x4xf32>, vector<256x4xf32>, vector<256x4xf32>, vector<256x4xf32>, vector<256x4xf32>, vector<256x4xf32>, vector<256x4xf32>, vector<256x4xf32>, vector<256x4xf32> -> vector<256x36xf32>
    %c0_30 = arith.constant 0 : index
    %c0_31 = arith.constant 0 : index
    %39 = vector.load %arg3[%c0_30, %c0_31] : memref<36x32xf32, #tpu.memory_space<vmem>>, vector<36x32xf32>
    %cst = arith.constant dense<0.000000e+00> : vector<256x32xf32>
    %40 = tpu.matmul %38, %39, %cst {dimension_numbers = #tpu.dot_dimension_numbers<[1], [0], [0], [1], [0, 0, 1, 1], [], []>} : vector<256x36xf32>, vector<36x32xf32>, vector<256x32xf32> -> vector<256x32xf32>
    %c0_32 = arith.constant 0 : index
    %c0_33 = arith.constant 0 : index
    %41 = vector.load %arg4[%c0_32, %c0_33] : memref<1x32xf32, #tpu.memory_space<vmem>>, vector<1x32xf32>
    %42 = vector.broadcast %41 : vector<1x32xf32> to vector<256x32xf32>
    %43 = arith.addf %40, %42 : vector<256x32xf32>
    %cst_34 = arith.constant 0.000000e+00 : f32
    %44 = vector.broadcast %cst_34 : f32 to vector<256x32xf32>
    %45 = arith.maximumf %43, %44 : vector<256x32xf32>
    %46 = vector.shape_cast %45 : vector<256x32xf32> to vector<2x128x32xf32>
    %cst_35 = arith.constant dense<0.000000e+00> : vector<2x32xf32>
    %47 = vector.multi_reduction <add>, %46, %cst_35 [1] : vector<2x128x32xf32> to vector<2x32xf32>
    %c0_i32_36 = arith.constant 0 : i32
    %48 = arith.cmpi eq, %arg1, %c0_i32_36 : i32
    %49 = arith.extui %48 : i1 to i32
    %c0_i32_37 = arith.constant 0 : i32
    %50 = arith.cmpi ne, %49, %c0_i32_37 : i32
    scf.if %50 {
      %cst_42 = arith.constant 0.000000e+00 : f32
      %54 = vector.broadcast %cst_42 : f32 to vector<2x32xf32>
      %c0_43 = arith.constant 0 : index
      %c0_44 = arith.constant 0 : index
      %55 = vector.load %arg5[%c0_43, %c0_44] : memref<2x32xf32, #tpu.memory_space<vmem>>, vector<2x32xf32>
      tpu.vector_store %arg5[%c0_43, %c0_44], %54 {strides = array<i32>} : memref<2x32xf32, #tpu.memory_space<vmem>>, vector<2x32xf32>,
    } else {
    }
    %c0_38 = arith.constant 0 : index
    %c0_39 = arith.constant 0 : index
    %51 = vector.load %arg5[%c0_38, %c0_39] : memref<2x32xf32, #tpu.memory_space<vmem>>, vector<2x32xf32>
    %52 = arith.addf %51, %47 : vector<2x32xf32>
    %c0_40 = arith.constant 0 : index
    %c0_41 = arith.constant 0 : index
    %53 = vector.load %arg5[%c0_40, %c0_41] : memref<2x32xf32, #tpu.memory_space<vmem>>, vector<2x32xf32>
    tpu.vector_store %arg5[%c0_40, %c0_41], %52 {strides = array<i32>} : memref<2x32xf32, #tpu.memory_space<vmem>>, vector<2x32xf32>,
    return
  }
  func.func @transform_0(%arg0: i32, %arg1: i32) -> (i32, i32, i32, i32) {
    %c0_i32 = arith.constant 0 : i32
    %c0_i32_0 = arith.constant 0 : i32
    %c0_i32_1 = arith.constant 0 : i32
    %c0_i32_2 = arith.constant 0 : i32
    return %arg0, %c0_i32, %c0_i32_0, %c0_i32_1 : i32, i32, i32, i32
  }
  func.func @transform_1(%arg0: i32, %arg1: i32) -> (i32, i32) {
    %c0_i32 = arith.constant 0 : i32
    %c0_i32_0 = arith.constant 0 : i32
    %c0_i32_1 = arith.constant 0 : i32
    return %c0_i32, %c0_i32_0 : i32, i32
  }
  func.func @transform_2(%arg0: i32, %arg1: i32) -> (i32, i32) {
    %c0_i32 = arith.constant 0 : i32
    %c0_i32_0 = arith.constant 0 : i32
    %c0_i32_1 = arith.constant 0 : i32
    return %c0_i32, %c0_i32_0 : i32, i32
  }
  func.func @transform_3(%arg0: i32, %arg1: i32) -> (i32, i32) {
    %c0_i32 = arith.constant 0 : i32
    %c0_i32_0 = arith.constant 0 : i32
    return %arg0, %c0_i32 : i32, i32
  }
}

</mosaic_0001>

<bundles_post_ra>
// kernel: tpu_custom_call.1
= control target key start
LH: loop header
LB: loop body
LE: loop exit
PB: predicated region body
PF: predicated region fallthrough
CT: control target
= control target key end

     0   :  { %8 = vsyncpa [#allocation3], 0  ;;  %s2572_s12 = smov 0   ;;  %s2574_s13 = smov 0   ;;  %s4340_s0 = inlined_call_operand.vmem [shape: f32[2,18,18,4], index: 0, kind: input, shape index: {}]   ;;  %s4341_s1 = inlined_call_operand.vmem [shape: f32[36,32], index: 1, kind: input, shape index: {}]   ;;  %s4342_s2 = inlined_call_operand.vmem [shape: f32[1,32], index: 2, kind: input, shape index: {}]   ;;  %s4343_s3 = inlined_call_operand.hbm [shape: f32[2,32], index: 3, kind: output, shape index: {}]  }
   0x1   :  { %s2576_s14 = smov 0  }
   0x2 LB: > { %s2182_s15 = sadd.s32 4294967295, %s2540_s14   ;;  %s23_s16 = sadd.s32 1, %s2536_s13  ;;  %s2540_s14 = sphi %s2576_s14, %s14_s14   ;;  %s2536_s13 = sphi %s2574_s13, %s4598_s13   ;;  %s2532_s12 = sphi %s2572_s12, %s4597_s12  }
   0x3   : > { %p24_p0 = scmp.ge.s32.totalorder %s23_s16, 2  ;;  %p2185_p1 = scmp.ge.s32.totalorder %s2540_s14, 1 }
   0x4   : > { %p152_p2 = scmp.lt.s32.totalorder %s2540_s14, 3 }
   0x5   : > { %s4600_s16 = smov (%p24_p0, %s23_s16), 0 }
   0x6   : > { %p153_p3 = pnand %p2185_p1, %p152_p2 }
   0x8   : > { %156 = sbr.rel (%p153_p3) target bundleno = 973 (0x3cd), region = 32 }
   0xd   : > { %s2187_s17 = smul.u32 192, %s2532_s12  ;;  %s2542_s21 = smov 4   ;;  %vm1500_vm0 = vcmask 31744   ;;  %vm1533_vm1 = vcmask 64512   ;;  %vm1566_vm2 = vcmask 97280   ;;  %vm1599_vm3 = vcmask 130048  }
   0xe   : > { %s2543_s22 = smov 8   ;;  %s2544_s23 = smov 12   ;;  %vm1632_vm4 = vcmask 162816   ;;  %vm1665_vm5 = vcmask 195584   ;;  %vm1870_vm6 = vcmask 1043456   ;;  %vm1698_vm7 = vcmask 228352  }
   0xf   : > { %s2597_s20 = scalar_lea.vmem %s4340_s0, %s2187_s17  ;;  %s2545_s24 = smov 16   ;;  %vm1731_vm8 = vcmask 261120   ;;  %vm1773_vm9 = vcmask 293888  }
  0x10   : > { %v2600_v0 = vld [vmem:[%s2597_s20 + $0x31] sm:$0xff]  ;;  %v2603_v1 = vld [vmem:[%s2597_s20 + $0x19] sm:$0xff]  ;;  %v214_v2 = vld [vmem:[%s2597_s20 + $0x1] sm:$0xff]  ;;  %s2546_s25 = smov 20   ;;  %s2547_s26 = smov 24  }
  0x11   : > { %516 = vrot.lane.b32.xlu2 %v2600_v0, %s2542_s21  ;;  %512 = vrot.lane.b32.xlu1 %v2603_v1, %s2542_s21  ;;  %v2612_v3 = vld [vmem:[%s2597_s20 + $0x39] sm:$0xff]  ;;  %v2615_v4 = vld [vmem:[%s2597_s20 + $0x21] sm:$0xff]  ;;  %s2548_s27 = smov 28   ;;  %s2549_s28 = smov 32  }
  0x12   : > { %508 = vrot.lane.b32.xlu0 %v214_v2, %s2542_s21  ;;  %v215_v5 = vld [vmem:[%s2597_s20 + $0x9] sm:$0xff]  ;;  %v2624_v6 = vld [vmem:[%s2597_s20 + $0x61] sm:$0xff]  ;;  %v2627_v7 = vld [vmem:[%s2597_s20 + $0x51] sm:$0xff]  ;;  %p2417_p4 = scmp.ne.s32.totalorder %s2532_s12, 0 }
  0x13   : > { %v2630_v8 = vld [vmem:[%s2597_s20 + $0x49] sm:$0xff]  ;;  %v2639_v9 = vld [vmem:[%s2597_s20 + $0x81] sm:$0xff]  ;;  %v2642_v10 = vld [vmem:[%s2597_s20 + $0x79] sm:$0xff] }
  0x14   : > { %v2645_v11 = vld [vmem:[%s2597_s20 + $0x69] sm:$0xff]  ;;  %v2657_v13 = vld [vmem:[%s2597_s20 + $0x99] sm:$0xff]  ;;  %v2660_v14 = vld [vmem:[%s2597_s20 + $0x91] sm:$0xff] }
  0x15   : > { %v2654_v12 = vld [vmem:[%s2597_s20 + $0xa9] sm:$0xff]  ;;  %v231_v15 = vld [vmem:[%s2597_s20 + $0x1b9] sm:$0xff]  ;;  %v230_v16 = vld [vmem:[%s2597_s20 + $0x1b1] sm:$0xff] }
  0x16   : > { %v2671_v17 = vld [vmem:[%s2597_s20 + $0xb1] sm:$0xff]  ;;  %v2678_v18 = vld [vmem:[%s2597_s20 + $0x1e1] sm:$0xff]  ;;  %v2684_v20 = vld [vmem:[%s2597_s20 + $0x1c9] sm:$0xff] }
  0x17   : > { %v2681_v19 = vld [vmem:[%s2597_s20 + $0x1d1] sm:$0xff]  ;;  %v2693_v21 = vld [vmem:[%s2597_s20 + $0x201] sm:$0xff]  ;;  %v2696_v22 = vld [vmem:[%s2597_s20 + $0x1f9] sm:$0xff] }
  0x18   : > { %v2699_v23 = vld [vmem:[%s2597_s20 + $0x1e9] sm:$0xff]  ;;  %v2711_v25 = vld [vmem:[%s2597_s20 + $0x219] sm:$0xff]  ;;  %v2714_v26 = vld [vmem:[%s2597_s20 + $0x211] sm:$0xff] }
  0x19   : > { %518 = vrot.lane.b32.xlu2 %v2612_v3, %s2542_s21  ;;  %514 = vrot.lane.b32.xlu1 %v2615_v4, %s2542_s21  ;;  %v2708_v24 = vld [vmem:[%s2597_s20 + $0x229] sm:$0xff]  ;;  %v2726_v28 = vld [vmem:[%s2597_s20 + $0x241] sm:$0xff] }
  0x1a   : > { %510 = vrot.lane.b32.xlu0 %v215_v5, %s2542_s21  ;;  %v2723_v27 = vld [vmem:[%s2597_s20 + $0x249] sm:$0xff]  ;;  %v2729_v29 = vld [vmem:[%s2597_s20 + $0x231] sm:$0xff]  ;;  %v2739_v31 = vld [vmem:[%s2597_s20 + $0x261] sm:$0xff] }
  0x1b   : > { %v246_v30 = vld [vmem:[%s2597_s20 + $0x2] sm:$0xff]  ;;  %v2742_v32 = vld [vmem:[%s2597_s20 + $0x259] sm:$0xff]  ;;  %v247_v35 = vld [vmem:[%s2597_s20 + $0xa] sm:$0xff] }
  0x1c   : > { %v2750_v33 = vld [vmem:[%s2597_s20 + $0x22] sm:$0xff]  ;;  %v2753_v34 = vld [vmem:[%s2597_s20 + $0x1a] sm:$0xff]  ;;  %v2764_v37 = vld [vmem:[%s2597_s20 + $0x4a] sm:$0xff] }
  0x1d   : > { %v2767_v38 = vld [vmem:[%s2597_s20 + $0x3a] sm:$0xff]  ;;  %v2770_v39 = vld [vmem:[%s2597_s20 + $0x32] sm:$0xff]  ;;  %v2781_v41 = vld [vmem:[%s2597_s20 + $0x6a] sm:$0xff] }
  0x1e   : > { %v2784_v42 = vld [vmem:[%s2597_s20 + $0x62] sm:$0xff]  ;;  %v2787_v43 = vld [vmem:[%s2597_s20 + $0x52] sm:$0xff]  ;;  %v2804_v47 = vld [vmem:[%s2597_s20 + $0x7a] sm:$0xff] }
  0x1f   : > { %v2798_v45 = vld [vmem:[%s2597_s20 + $0x92] sm:$0xff]  ;;  %v2801_v46 = vld [vmem:[%s2597_s20 + $0x82] sm:$0xff]  ;;  %v2822_v52 = vld [vmem:[%s2597_s20 + $0xaa] sm:$0xff] }
  0x20   : > { %v2819_v51 = vld [vmem:[%s2597_s20 + $0xb2] sm:$0xff]  ;;  %v2825_v53 = vld [vmem:[%s2597_s20 + $0x9a] sm:$0xff]  ;;  %v2840_v57 = vld [vmem:[%s2597_s20 + $0x1ca] sm:$0xff] }
  0x21   : > { %524 = vrot.lane.b32.xlu2 %v2624_v6, %s2542_s21  ;;  %522 = vrot.lane.b32.xlu1 %v2627_v7, %s2542_s21  ;;  %v263_v58 = vld [vmem:[%s2597_s20 + $0x1ba] sm:$0xff]  ;;  %v262_v59 = vld [vmem:[%s2597_s20 + $0x1b2] sm:$0xff] }
  0x22   : > { %520 = vrot.lane.b32.xlu0 %v2630_v8, %s2542_s21  ;;  %v2855_v63 = vld [vmem:[%s2597_s20 + $0x1ea] sm:$0xff]  ;;  %v2858_v2 = vld [vmem:[%s2597_s20 + $0x1e2] sm:$0xff]  ;;  %v2861_v5 = vld [vmem:[%s2597_s20 + $0x1d2] sm:$0xff] }
  0x29   : > { %530 = vrot.lane.b32.xlu2 %v2639_v9, %s2542_s21  ;;  %528 = vrot.lane.b32.xlu1 %v2642_v10, %s2542_s21 }
  0x2a   : > { %526 = vrot.lane.b32.xlu0 %v2645_v11, %s2542_s21 }
  0x31   : > { %536 = vrot.lane.b32.xlu2 %v2654_v12, %s2542_s21  ;;  %534 = vrot.lane.b32.xlu1 %v2657_v13, %s2542_s21 }
  0x32   : > { %532 = vrot.lane.b32.xlu0 %v2660_v14, %s2542_s21 }
  0x39   : > { %542 = vrot.lane.b32.xlu2 %v231_v15, %s2542_s21  ;;  %540 = vrot.lane.b32.xlu1 %v230_v16, %s2542_s21 }
  0x3a   : > { %538 = vrot.lane.b32.xlu0 %v2671_v17, %s2542_s21 }
  0x41   : > { %548 = vrot.lane.b32.xlu2 %v2678_v18, %s2542_s21  ;;  %546 = vrot.lane.b32.xlu1 %v2681_v19, %s2542_s21 }
  0x42   : > { %544 = vrot.lane.b32.xlu0 %v2684_v20, %s2542_s21 }
  0x49   : > { %554 = vrot.lane.b32.xlu2 %v2693_v21, %s2542_s21  ;;  %552 = vrot.lane.b32.xlu1 %v2696_v22, %s2542_s21 }
  0x4a   : > { %550 = vrot.lane.b32.xlu0 %v2699_v23, %s2542_s21 }
  0x51   : > { %560 = vrot.lane.b32.xlu2 %v2708_v24, %s2542_s21  ;;  %558 = vrot.lane.b32.xlu1 %v2711_v25, %s2542_s21 }
  0x52   : > { %556 = vrot.lane.b32.xlu0 %v2714_v26, %s2542_s21 }
  0x59   : > { %566 = vrot.lane.b32.xlu2 %v2723_v27, %s2542_s21  ;;  %564 = vrot.lane.b32.xlu1 %v2726_v28, %s2542_s21 }
  0x5a   : > { %562 = vrot.lane.b32.xlu0 %v2729_v29, %s2542_s21 }
  0x61   : > { %636 = vrot.lane.b32.xlu2 %v246_v30, %s2543_s22  ;;  %570 = vrot.lane.b32.xlu1 %v2739_v31, %s2542_s21 }
  0x62   : > { %568 = vrot.lane.b32.xlu0 %v2742_v32, %s2542_s21 }
  0x69   : > { %642 = vrot.lane.b32.xlu2 %v2750_v33, %s2543_s22  ;;  %640 = vrot.lane.b32.xlu1 %v2753_v34, %s2543_s22 }
  0x6a   : > { %638 = vrot.lane.b32.xlu0 %v247_v35, %s2543_s22  ;;  %v2876_v35 = vld [vmem:[%s2597_s20 + $0x212] sm:$0xff] }
  0x6b   : > { %v2761_v36 = vpop.permute.xlu2 %516 }
  0x6c   : > { %4383 = vst [vmem:[#allocation5_spill] sm:$0xff] %v2761_v36  ;;  %v2921_v36 = vld [vmem:[%s2597_s20 + $0x24a] sm:$0xff] }
  0x71   : > { %648 = vrot.lane.b32.xlu2 %v2764_v37, %s2543_s22  ;;  %646 = vrot.lane.b32.xlu1 %v2767_v38, %s2543_s22 }
  0x72   : > { %644 = vrot.lane.b32.xlu0 %v2770_v39, %s2543_s22 }
  0x73   : > { %v2778_v40 = vpop.permute.xlu2 %518 }
  0x74   : > { %4384 = vst [vmem:[#allocation6_spill] sm:$0xff] %v2778_v40 }
  0x79   : > { %654 = vrot.lane.b32.xlu2 %v2781_v41, %s2543_s22  ;;  %652 = vrot.lane.b32.xlu1 %v2784_v42, %s2543_s22 }
  0x7a   : > { %650 = vrot.lane.b32.xlu0 %v2787_v43, %s2543_s22 }
  0x7b   : > { %v2795_v44 = vpop.permute.xlu2 %524 }
  0x7c   : > { %4385 = vst [vmem:[#allocation7_spill] sm:$0xff] %v2795_v44  ;;  %v2897_v44 = vld [vmem:[%s2597_s20 + $0x232] sm:$0xff] }
  0x7d   : > { %4400 = vst [vmem:[#allocation22_spill] sm:$0xff] %v2897_v44 }
  0x81   : > { %660 = vrot.lane.b32.xlu2 %v2798_v45, %s2543_s22  ;;  %658 = vrot.lane.b32.xlu1 %v2801_v46, %s2543_s22 }
  0x82   : > { %656 = vrot.lane.b32.xlu0 %v2804_v47, %s2543_s22 }
  0x83   : > { %v2812_v48 = vpop.permute.xlu2 %530  ;;  %v2814_v49 = vpop.permute.xlu1 %512 }
  0x84   : > { %4386 = vst [vmem:[#allocation8_spill] sm:$0xff] %v2812_v48  ;;  %v2816_v50 = vpop.permute.xlu0 %508 }
  0x85   : > { %4387 = vst [vmem:[#allocation9_spill] sm:$0xff] %v2814_v49  ;;  %v2945_v49 = vld [vmem:[%s2597_s20 + $0x20] sm:$0xff] }
  0x86   : > { %4388 = vst [vmem:[#allocation10_spill] sm:$0xff] %v2816_v50  ;;  %v2903_v50 = vld [vmem:[%s2597_s20 + $0x21a] sm:$0xff] }
  0x87   : > { %4411 = vst [vmem:[#allocation33_spill] sm:$0xff] %v2945_v49 }
  0x89   : > { %666 = vrot.lane.b32.xlu2 %v2819_v51, %s2543_s22  ;;  %664 = vrot.lane.b32.xlu1 %v2822_v52, %s2543_s22 }
  0x8a   : > { %662 = vrot.lane.b32.xlu0 %v2825_v53, %s2543_s22 }
  0x8b   : > { %v2833_v54 = vpop.permute.xlu2 %536  ;;  %v2835_v55 = vpop.permute.xlu1 %514 }
  0x8c   : > { %4389 = vst [vmem:[#allocation11_spill] sm:$0xff] %v2833_v54  ;;  %v2837_v56 = vpop.permute.xlu0 %510  ;;  %v2942_v54 = vld [vmem:[%s2597_s20 + $0x18] sm:$0xff] }
  0x8d   : > { %4390 = vst [vmem:[#allocation12_spill] sm:$0xff] %v2835_v55 }
  0x8e   : > { %4391 = vst [vmem:[#allocation13_spill] sm:$0xff] %v2837_v56  ;;  %v2900_v56 = vld [vmem:[%s2597_s20 + $0x22a] sm:$0xff] }
  0x8f   : > { %4410 = vst [vmem:[#allocation32_spill] sm:$0xff] %v2942_v54 }
  0x91   : > { %672 = vrot.lane.b32.xlu2 %v2840_v57, %s2543_s22  ;;  %670 = vrot.lane.b32.xlu1 %v263_v58, %s2543_s22  ;;  %v2879_v58 = vld [vmem:[%s2597_s20 + $0x202] sm:$0xff] }
  0x92   : > { %668 = vrot.lane.b32.xlu0 %v262_v59, %s2543_s22  ;;  %v2882_v59 = vld [vmem:[%s2597_s20 + $0x1fa] sm:$0xff] }
  0x93   : > { %v2848_v60 = vpop.permute.xlu2 %542  ;;  %v2850_v61 = vpop.permute.xlu1 %522 }
  0x94   : > { %4392 = vst [vmem:[#allocation14_spill] sm:$0xff] %v2848_v60  ;;  %v2852_v62 = vpop.permute.xlu0 %520  ;;  %v2939_v60 = vld [vmem:[%s2597_s20 + $0x262] sm:$0xff] }
  0x95   : > { %4393 = vst [vmem:[#allocation15_spill] sm:$0xff] %v2850_v61  ;;  %v2918_v61 = vld [vmem:[%s2597_s20 + $0x25a] sm:$0xff] }
  0x96   : > { %4394 = vst [vmem:[#allocation16_spill] sm:$0xff] %v2852_v62 }
  0x97   : > { %4404 = vst [vmem:[#allocation26_spill] sm:$0xff] %v2918_v61 }
  0x98   : > { %4409 = vst [vmem:[#allocation31_spill] sm:$0xff] %v2939_v60 }
  0x99   : > { %678 = vrot.lane.b32.xlu2 %v2855_v63, %s2543_s22  ;;  %676 = vrot.lane.b32.xlu1 %v2858_v2, %s2543_s22 }
  0x9a   : > { %674 = vrot.lane.b32.xlu0 %v2861_v5, %s2543_s22 }
  0x9b   : > { %v2869_v15 = vpop.permute.xlu2 %548  ;;  %v2871_v16 = vpop.permute.xlu1 %528 }
  0x9c   : > { %4395 = vst [vmem:[#allocation17_spill] sm:$0xff] %v2869_v15  ;;  %v2873_v30 = vpop.permute.xlu0 %526 }
  0x9d   : > { %4396 = vst [vmem:[#allocation18_spill] sm:$0xff] %v2871_v16 }
  0x9e   : > { %4397 = vst [vmem:[#allocation19_spill] sm:$0xff] %v2873_v30 }
  0xa1   : > { %684 = vrot.lane.b32.xlu2 %v2876_v35, %s2543_s22  ;;  %682 = vrot.lane.b32.xlu1 %v2879_v58, %s2543_s22 }
  0xa2   : > { %680 = vrot.lane.b32.xlu0 %v2882_v59, %s2543_s22 }
  0xa3   : > { %v2890_v48 = vpop.permute.xlu2 %554  ;;  %v2892_v16 = vpop.permute.xlu1 %534 }
  0xa4   : > { %4398 = vst [vmem:[#allocation20_spill] sm:$0xff] %v2890_v48  ;;  %v2894_v30 = vpop.permute.xlu0 %532  ;;  %v2924_v48 = vld [vmem:[%s2597_s20 + $0x242] sm:$0xff] }
  0xa5   : > { %4399 = vst [vmem:[#allocation21_spill] sm:$0xff] %v2894_v30 }
  0xa6   : > { %4405 = vst [vmem:[#allocation27_spill] sm:$0xff] %v2924_v48 }
  0xa9   : > { %690 = vrot.lane.b32.xlu2 %v2897_v44, %s2543_s22  ;;  %688 = vrot.lane.b32.xlu1 %v2900_v56, %s2543_s22  ;;  %v2964_v44 = vld [vmem:[%s2597_s20 + $0x30] sm:$0xff] }
  0xaa   : > { %686 = vrot.lane.b32.xlu0 %v2903_v50, %s2543_s22  ;;  %4416 = vst [vmem:[#allocation38_spill] sm:$0xff] %v2964_v44 }
  0xab   : > { %v2911_v40 = vpop.permute.xlu2 %560  ;;  %v2913_v30 = vpop.permute.xlu1 %540 }
  0xac   : > { %4401 = vst [vmem:[#allocation23_spill] sm:$0xff] %v2911_v40  ;;  %v2915_v62 = vpop.permute.xlu0 %538 }
  0xad   : > { %4402 = vst [vmem:[#allocation24_spill] sm:$0xff] %v2913_v30 }
  0xae   : > { %4403 = vst [vmem:[#allocation25_spill] sm:$0xff] %v2915_v62  ;;  %v3056_v62 = vld [vmem:[%s2597_s20 + $0x1d0] sm:$0xff] }
  0xaf   : > { %4441 = vst [vmem:[#allocation63_spill] sm:$0xff] %v3056_v62 }
  0xb1   : > { %696 = vrot.lane.b32.xlu2 %v2918_v61, %s2543_s22  ;;  %694 = vrot.lane.b32.xlu1 %v2921_v36, %s2543_s22 }
  0xb2   : > { %692 = vrot.lane.b32.xlu0 %v2924_v48, %s2543_s22  ;;  %v3136_v48 = vld [vmem:[%s2597_s20 + $0x260] sm:$0xff] }
  0xb3   : > { %v2932_v40 = vpop.permute.xlu2 %566  ;;  %v2934_v15 = vpop.permute.xlu1 %546 }
  0xb4   : > { %4406 = vst [vmem:[#allocation28_spill] sm:$0xff] %v2932_v40  ;;  %v2936_v30 = vpop.permute.xlu0 %544 }
  0xb5   : > { %4407 = vst [vmem:[#allocation29_spill] sm:$0xff] %v2934_v15  ;;  %v2961_v15 = vld [vmem:[%s2597_s20 + $0x48] sm:$0xff] }
  0xb6   : > { %4408 = vst [vmem:[#allocation30_spill] sm:$0xff] %v2936_v30  ;;  %v187_v30 = vld [vmem:[%s2597_s20 + $0x38] sm:$0xff] }
  0xb7   : > { %4415 = vst [vmem:[#allocation37_spill] sm:$0xff] %v2961_v15 }
  0xb9   : > { %766 = vrot.lane.b32.xlu2 %v2945_v49, %s2544_s23  ;;  %764 = vrot.lane.b32.xlu1 %v2942_v54, %s2544_s23  ;;  %v190_v54 = vld [vmem:[%s2597_s20 + $0x60] sm:$0xff]  ;;  %v2979_v49 = vld [vmem:[%s2597_s20 + $0x68] sm:$0xff] }
  0xba   : > { %698 = vrot.lane.b32.xlu0 %v2939_v60, %s2543_s22  ;;  %4420 = vst [vmem:[#allocation42_spill] sm:$0xff] %v2979_v49  ;;  %v2982_v60 = vld [vmem:[%s2597_s20 + $0x50] sm:$0xff] }
  0xbb   : > { %v2953_v40 = vpop.permute.xlu2 %636  ;;  %v2955_v55 = vpop.permute.xlu1 %552  ;;  %4421 = vst [vmem:[#allocation43_spill] sm:$0xff] %v2982_v60 }
  0xbc   : > { %4412 = vst [vmem:[#allocation34_spill] sm:$0xff] %v2953_v40  ;;  %v2957_v61 = vpop.permute.xlu0 %550 }
  0xbd   : > { %4413 = vst [vmem:[#allocation35_spill] sm:$0xff] %v2955_v55 }
  0xbe   : > { %4414 = vst [vmem:[#allocation36_spill] sm:$0xff] %v2957_v61 }
  0xc1   : > { %772 = vrot.lane.b32.xlu2 %v2961_v15, %s2544_s23  ;;  %770 = vrot.lane.b32.xlu1 %v187_v30, %s2544_s23 }
  0xc2   : > { %768 = vrot.lane.b32.xlu0 %v2964_v44, %s2544_s23 }
  0xc3   : > { %v2971_v40 = vpop.permute.xlu2 %642  ;;  %v2973_v55 = vpop.permute.xlu1 %558 }
  0xc4   : > { %4417 = vst [vmem:[#allocation39_spill] sm:$0xff] %v2971_v40  ;;  %v2975_v61 = vpop.permute.xlu0 %556  ;;  %v3000_v40 = vld [vmem:[%s2597_s20 + $0x78] sm:$0xff] }
  0xc5   : > { %4418 = vst [vmem:[#allocation40_spill] sm:$0xff] %v2973_v55  ;;  %v2997_v55 = vld [vmem:[%s2597_s20 + $0x90] sm:$0xff] }
  0xc6   : > { %4419 = vst [vmem:[#allocation41_spill] sm:$0xff] %v2975_v61  ;;  %v193_v61 = vld [vmem:[%s2597_s20 + $0x80] sm:$0xff] }
  0xc7   : > { %4425 = vst [vmem:[#allocation47_spill] sm:$0xff] %v2997_v55 }
  0xc8   : > { %4426 = vst [vmem:[#allocation48_spill] sm:$0xff] %v3000_v40 }
  0xc9   : > { %778 = vrot.lane.b32.xlu2 %v2979_v49, %s2544_s23  ;;  %776 = vrot.lane.b32.xlu1 %v190_v54, %s2544_s23  ;;  %v3014_v49 = vld [vmem:[%s2597_s20 + $0xa8] sm:$0xff] }
  0xca   : > { %774 = vrot.lane.b32.xlu0 %v2982_v60, %s2544_s23  ;;  %4430 = vst [vmem:[#allocation52_spill] sm:$0xff] %v3014_v49  ;;  %v3020_v60 = vld [vmem:[%s2597_s20 + $0x98] sm:$0xff] }
  0xcb   : > { %v2989_v30 = vpop.permute.xlu2 %648  ;;  %v2991_v44 = vpop.permute.xlu1 %564 }
  0xcc   : > { %4422 = vst [vmem:[#allocation44_spill] sm:$0xff] %v2989_v30  ;;  %v2993_v15 = vpop.permute.xlu0 %562 }
  0xcd   : > { %4423 = vst [vmem:[#allocation45_spill] sm:$0xff] %v2991_v44 }
  0xce   : > { %4424 = vst [vmem:[#allocation46_spill] sm:$0xff] %v2993_v15  ;;  %v3017_v15 = vld [vmem:[%s2597_s20 + $0xb0] sm:$0xff] }
  0xcf   : > { %4431 = vst [vmem:[#allocation53_spill] sm:$0xff] %v3017_v15 }
  0xd1   : > { %784 = vrot.lane.b32.xlu2 %v2997_v55, %s2544_s23  ;;  %782 = vrot.lane.b32.xlu1 %v193_v61, %s2544_s23  ;;  %v2205_v55 = vld [vmem:[%s2597_s20 + $0xc8] sm:$0xff] }
  0xd2   : > { %780 = vrot.lane.b32.xlu0 %v3000_v40, %s2544_s23  ;;  %v3037_v40 = vld [vmem:[%s2597_s20 + $0x1c8] sm:$0xff] }
  0xd3   : > { %v3007_v54 = vpop.permute.xlu2 %654  ;;  %v3009_v30 = vpop.permute.xlu1 %570  ;;  %4435 = vst [vmem:[#allocation57_spill] sm:$0xff] %v3037_v40 }
  0xd4   : > { %4427 = vst [vmem:[#allocation49_spill] sm:$0xff] %v3007_v54  ;;  %v3011_v44 = vpop.permute.xlu0 %568 }
  0xd5   : > { %4428 = vst [vmem:[#allocation50_spill] sm:$0xff] %v3009_v30  ;;  %v2204_v30 = vld [vmem:[%s2597_s20 + $0xc0] sm:$0xff] }
  0xd6   : > { %4429 = vst [vmem:[#allocation51_spill] sm:$0xff] %v3011_v44 }
  0xd9   : > { %790 = vrot.lane.b32.xlu2 %v3017_v15, %s2544_s23  ;;  %788 = vrot.lane.b32.xlu1 %v3014_v49, %s2544_s23  ;;  %v3053_v15 = vld [vmem:[%s2597_s20 + $0x1e8] sm:$0xff] }
  0xda   : > { %786 = vrot.lane.b32.xlu0 %v3020_v60, %s2544_s23  ;;  %4440 = vst [vmem:[#allocation62_spill] sm:$0xff] %v3053_v15 }
  0xdb   : > { %v3028_v61 = vpop.permute.xlu2 %660  ;;  %v3030_v54 = vpop.permute.xlu1 %640 }
  0xdc   : > { %4432 = vst [vmem:[#allocation54_spill] sm:$0xff] %v3028_v61  ;;  %v3032_v44 = vpop.permute.xlu0 %638 }
  0xdd   : > { %4433 = vst [vmem:[#allocation55_spill] sm:$0xff] %v3030_v54 }
  0xde   : > { %4434 = vst [vmem:[#allocation56_spill] sm:$0xff] %v3032_v44  ;;  %v3050_v44 = vld [vmem:[%s2597_s20 + $0x1e0] sm:$0xff] }
  0xdf   : > { %4439 = vst [vmem:[#allocation61_spill] sm:$0xff] %v3050_v44 }
  0xe1   : > { %796 = vrot.lane.b32.xlu2 %v3037_v40, %s2544_s23  ;;  %794 = vrot.lane.b32.xlu1 %v2205_v55, %s2544_s23  ;;  %v3074_v40 = vld [vmem:[%s2597_s20 + $0x210] sm:$0xff] }
  0xe2   : > { %792 = vrot.lane.b32.xlu0 %v2204_v30, %s2544_s23  ;;  %4446 = vst [vmem:[#allocation68_spill] sm:$0xff] %v3074_v40 }
  0xe3   : > { %v3043_v49 = vpop.permute.xlu2 %666  ;;  %v3045_v61 = vpop.permute.xlu1 %646 }
  0xe4   : > { %4436 = vst [vmem:[#allocation58_spill] sm:$0xff] %v3043_v49  ;;  %v3047_v54 = vpop.permute.xlu0 %644  ;;  %v3077_v49 = vld [vmem:[%s2597_s20 + $0x1f8] sm:$0xff] }
  0xe5   : > { %4437 = vst [vmem:[#allocation59_spill] sm:$0xff] %v3045_v61 }
  0xe6   : > { %4438 = vst [vmem:[#allocation60_spill] sm:$0xff] %v3047_v54  ;;  %v3071_v54 = vld [vmem:[%s2597_s20 + $0x200] sm:$0xff] }
  0xe7   : > { %4445 = vst [vmem:[#allocation67_spill] sm:$0xff] %v3071_v54 }
  0xe8   : > { %4447 = vst [vmem:[#allocation69_spill] sm:$0xff] %v3077_v49 }
  0xe9   : > { %802 = vrot.lane.b32.xlu2 %v3053_v15, %s2544_s23  ;;  %800 = vrot.lane.b32.xlu1 %v3050_v44, %s2544_s23  ;;  %v3092_v44 = vld [vmem:[%s2597_s20 + $0x228] sm:$0xff] }
  0xea   : > { %798 = vrot.lane.b32.xlu0 %v3056_v62, %s2544_s23  ;;  %4451 = vst [vmem:[#allocation73_spill] sm:$0xff] %v3092_v44  ;;  %v3098_v62 = vld [vmem:[%s2597_s20 + $0x218] sm:$0xff] }
  0xeb   : > { %v3064_v55 = vpop.permute.xlu2 %672  ;;  %v3066_v30 = vpop.permute.xlu1 %652  ;;  %4453 = vst [vmem:[#allocation75_spill] sm:$0xff] %v3098_v62 }
  0xec   : > { %4442 = vst [vmem:[#allocation64_spill] sm:$0xff] %v3064_v55  ;;  %v3068_v61 = vpop.permute.xlu0 %650  ;;  %v3095_v55 = vld [vmem:[%s2597_s20 + $0x230] sm:$0xff] }
  0xed   : > { %4443 = vst [vmem:[#allocation65_spill] sm:$0xff] %v3066_v30 }
  0xee   : > { %4444 = vst [vmem:[#allocation66_spill] sm:$0xff] %v3068_v61 }
  0xef   : > { %4452 = vst [vmem:[#allocation74_spill] sm:$0xff] %v3095_v55 }
  0xf1   : > { %808 = vrot.lane.b32.xlu2 %v3074_v40, %s2544_s23  ;;  %806 = vrot.lane.b32.xlu1 %v3071_v54, %s2544_s23  ;;  %v3119_v40 = vld [vmem:[%s2597_s20 + $0x240] sm:$0xff] }
  0xf2   : > { %804 = vrot.lane.b32.xlu0 %v3077_v49, %s2544_s23  ;;  %v3116_v49 = vld [vmem:[%s2597_s20 + $0x258] sm:$0xff]  ;;  %4458 = vst [vmem:[#allocation80_spill] sm:$0xff] %v3119_v40 }
  0xf3   : > { %v3085_v30 = vpop.permute.xlu2 %678  ;;  %v3087_v61 = vpop.permute.xlu1 %658  ;;  %4457 = vst [vmem:[#allocation79_spill] sm:$0xff] %v3116_v49 }
  0xf4   : > { %4448 = vst [vmem:[#allocation70_spill] sm:$0xff] %v3085_v30  ;;  %v3089_v15 = vpop.permute.xlu0 %656  ;;  %v3113_v30 = vld [vmem:[%s2597_s20 + $0x248] sm:$0xff] }
  0xf5   : > { %4449 = vst [vmem:[#allocation71_spill] sm:$0xff] %v3087_v61 }
  0xf6   : > { %4450 = vst [vmem:[#allocation72_spill] sm:$0xff] %v3089_v15 }
  0xf7   : > { %4456 = vst [vmem:[#allocation78_spill] sm:$0xff] %v3113_v30 }
  0xf9   : > { %814 = vrot.lane.b32.xlu2 %v3095_v55, %s2544_s23  ;;  %812 = vrot.lane.b32.xlu1 %v3092_v44, %s2544_s23 }
  0xfa   : > { %810 = vrot.lane.b32.xlu0 %v3098_v62, %s2544_s23  ;;  %v2220_v62 = vld [vmem:[%s2597_s20 + $0x270] sm:$0xff] }
  0xfb   : > { %v3106_v61 = vpop.permute.xlu2 %684  ;;  %v3108_v15 = vpop.permute.xlu1 %664 }
  0xfc   : > { %4454 = vst [vmem:[#allocation76_spill] sm:$0xff] %v3106_v61  ;;  %v3110_v54 = vpop.permute.xlu0 %662  ;;  %v2221_v61 = vld [vmem:[%s2597_s20 + $0x278] sm:$0xff] }
  0xfd   : > { %4455 = vst [vmem:[#allocation77_spill] sm:$0xff] %v3108_v15 }
 0x101   : > { %820 = vrot.lane.b32.xlu2 %v3116_v49, %s2544_s23  ;;  %818 = vrot.lane.b32.xlu1 %v3113_v30, %s2544_s23 }
 0x102   : > { %816 = vrot.lane.b32.xlu0 %v3119_v40, %s2544_s23 }
 0x103   : > { %v3127_v44 = vpop.permute.xlu2 %690  ;;  %v3129_v15 = vpop.permute.xlu1 %670 }
 0x104   : > { %v3131_v55 = vpop.permute.xlu0 %668 }
 0x105   : > { %4459 = vst [vmem:[#allocation81_spill] sm:$0xff] %v3131_v55 }
 0x109   : > { %826 = vrot.lane.b32.xlu2 %v2221_v61, %s2544_s23  ;;  %824 = vrot.lane.b32.xlu1 %v2220_v62, %s2544_s23 }
 0x10a   : > { %822 = vrot.lane.b32.xlu0 %v3136_v48, %s2544_s23 }
 0x10b   : > { %v3142_v30 = vpop.permute.xlu2 %696  ;;  %v3144_v49 = vpop.permute.xlu1 %676 }
 0x10c   : > { %v3146_v40 = vpop.permute.xlu0 %674 }
 0x111   : > { %896 = vrot.lane.b32.xlu2 %v2600_v0, %s2545_s24  ;;  %894 = vrot.lane.b32.xlu1 %v2615_v4, %s2545_s24 }
 0x112   : > { %892 = vrot.lane.b32.xlu0 %v2603_v1, %s2545_s24 }
 0x113   : > { %v3154_v62 = vpop.permute.xlu2 %766  ;;  %v3156_v61 = vpop.permute.xlu1 %682 }
 0x114   : > { %4460 = vst [vmem:[#allocation82_spill] sm:$0xff] %v3154_v62  ;;  %v3158_v55 = vpop.permute.xlu0 %680  ;;  %v2236_v62 = vld [vmem:[%s2597_s20 + $0xc1] sm:$0xff] }
 0x119   : > { %902 = vrot.lane.b32.xlu2 %v2627_v7, %s2545_s24  ;;  %900 = vrot.lane.b32.xlu1 %v2630_v8, %s2545_s24 }
 0x11a   : > { %898 = vrot.lane.b32.xlu0 %v2612_v3, %s2545_s24 }
 0x11b   : > { %v3166_v0 = vpop.permute.xlu2 %772  ;;  %v3168_v4 = vpop.permute.xlu1 %688 }
 0x11c   : > { %v3170_v1 = vpop.permute.xlu0 %686 }
 0x121   : > { %908 = vrot.lane.b32.xlu2 %v2642_v10, %s2545_s24  ;;  %906 = vrot.lane.b32.xlu1 %v2645_v11, %s2545_s24 }
 0x122   : > { %904 = vrot.lane.b32.xlu0 %v2624_v6, %s2545_s24 }
 0x123   : > { %v3178_v7 = vpop.permute.xlu2 %778  ;;  %v3180_v3 = vpop.permute.xlu1 %694 }
 0x124   : > { %v3182_v8 = vpop.permute.xlu0 %692 }
 0x129   : > { %914 = vrot.lane.b32.xlu2 %v2657_v13, %s2545_s24  ;;  %912 = vrot.lane.b32.xlu1 %v2660_v14, %s2545_s24 }
 0x12a   : > { %910 = vrot.lane.b32.xlu0 %v2639_v9, %s2545_s24 }
 0x12b   : > { %v3190_v10 = vpop.permute.xlu2 %784  ;;  %v3192_v11 = vpop.permute.xlu1 %764 }
 0x12c   : > { %4461 = vst [vmem:[#allocation83_spill] sm:$0xff] %v3190_v10  ;;  %v3194_v6 = vpop.permute.xlu0 %698  ;;  %v2237_v10 = vld [vmem:[%s2597_s20 + $0xc9] sm:$0xff] }
 0x12d   : > { %4462 = vst [vmem:[#allocation84_spill] sm:$0xff] %v3192_v11 }
 0x131   : > { %920 = vrot.lane.b32.xlu2 %v2236_v62, %s2545_s24  ;;  %918 = vrot.lane.b32.xlu1 %v2671_v17, %s2545_s24 }
 0x132   : > { %916 = vrot.lane.b32.xlu0 %v2654_v12, %s2545_s24 }
 0x133   : > { %v3202_v13 = vpop.permute.xlu2 %790  ;;  %v3204_v14 = vpop.permute.xlu1 %770 }
 0x134   : > { %v3206_v9 = vpop.permute.xlu0 %768 }
 0x139   : > { %926 = vrot.lane.b32.xlu2 %v2681_v19, %s2545_s24  ;;  %924 = vrot.lane.b32.xlu1 %v2684_v20, %s2545_s24 }
 0x13a   : > { %922 = vrot.lane.b32.xlu0 %v2237_v10, %s2545_s24 }
 0x13b   : > { %v3214_v62 = vpop.permute.xlu2 %796  ;;  %v3216_v17 = vpop.permute.xlu1 %776 }
 0x13c   : > { %v3218_v12 = vpop.permute.xlu0 %774 }
 0x13d   : > { %4463 = vst [vmem:[#allocation85_spill] sm:$0xff] %v3218_v12 }
 0x141   : > { %932 = vrot.lane.b32.xlu2 %v2696_v22, %s2545_s24  ;;  %930 = vrot.lane.b32.xlu1 %v2699_v23, %s2545_s24 }
 0x142   : > { %928 = vrot.lane.b32.xlu0 %v2678_v18, %s2545_s24 }
 0x143   : > { %v3226_v19 = vpop.permute.xlu2 %802  ;;  %v3228_v20 = vpop.permute.xlu1 %782 }
 0x144   : > { %4464 = vst [vmem:[#allocation86_spill] sm:$0xff] %v3228_v20  ;;  %v3230_v10 = vpop.permute.xlu0 %780 }
 0x145   : > { %4465 = vst [vmem:[#allocation87_spill] sm:$0xff] %v3230_v10  ;;  %v3336_v10 = vld [vmem:[%s2597_s20 + $0xc2] sm:$0xff] }
 0x146   : > { %4475 = vst [vmem:[#allocation97_spill] sm:$0xff] %v3336_v10 }
 0x149   : > { %938 = vrot.lane.b32.xlu2 %v2711_v25, %s2545_s24  ;;  %936 = vrot.lane.b32.xlu1 %v2714_v26, %s2545_s24 }
 0x14a   : > { %934 = vrot.lane.b32.xlu0 %v2693_v21, %s2545_s24 }
 0x14b   : > { %v3238_v22 = vpop.permute.xlu2 %808  ;;  %v3240_v18 = vpop.permute.xlu1 %788 }
 0x14c   : > { %4466 = vst [vmem:[#allocation88_spill] sm:$0xff] %v3240_v18  ;;  %v3242_v23 = vpop.permute.xlu0 %786  ;;  %v3269_v18 = vld [vmem:[%s2597_s20 + $0x279] sm:$0xff] }
 0x14d   : > { %4467 = vst [vmem:[#allocation89_spill] sm:$0xff] %v3242_v23  ;;  %v3272_v23 = vld [vmem:[%s2597_s20 + $0x271] sm:$0xff] }
 0x14e   : > { %4468 = vst [vmem:[#allocation90_spill] sm:$0xff] %v3269_v18 }
 0x14f   : > { %4469 = vst [vmem:[#allocation91_spill] sm:$0xff] %v3272_v23 }
 0x151   : > { %944 = vrot.lane.b32.xlu2 %v2726_v28, %s2545_s24  ;;  %942 = vrot.lane.b32.xlu1 %v2729_v29, %s2545_s24 }
 0x152   : > { %940 = vrot.lane.b32.xlu0 %v2708_v24, %s2545_s24 }
 0x153   : > { %v3250_v25 = vpop.permute.xlu2 %814  ;;  %v3252_v21 = vpop.permute.xlu1 %794 }
 0x154   : > { %v3254_v26 = vpop.permute.xlu0 %792 }
 0x159   : > { %950 = vrot.lane.b32.xlu2 %v2739_v31, %s2545_s24  ;;  %948 = vrot.lane.b32.xlu1 %v2742_v32, %s2545_s24 }
 0x15a   : > { %946 = vrot.lane.b32.xlu0 %v2723_v27, %s2545_s24 }
 0x15b   : > { %v3262_v28 = vpop.permute.xlu2 %820  ;;  %v3264_v29 = vpop.permute.xlu1 %800 }
 0x15c   : > { %v3266_v24 = vpop.permute.xlu0 %798 }
 0x161   : > { %1020 = vrot.lane.b32.xlu2 %v2753_v34, %s2546_s25  ;;  %954 = vrot.lane.b32.xlu1 %v3269_v18, %s2545_s24 }
 0x162   : > { %952 = vrot.lane.b32.xlu0 %v3272_v23, %s2545_s24  ;;  %v1514_v23 = vsel %vm1500_vm0, %v3020_v60, %v2892_v16 }
 0x163   : > { %v3280_v27 = vpop.permute.xlu2 %826  ;;  %v3282_v31 = vpop.permute.xlu1 %806 }
 0x164   : > { %v3284_v32 = vpop.permute.xlu0 %804 }
 0x169   : > { %1026 = vrot.lane.b32.xlu2 %v2767_v38, %s2546_s25  ;;  %1024 = vrot.lane.b32.xlu1 %v2770_v39, %s2546_s25 }
 0x16a   : > { %1022 = vrot.lane.b32.xlu0 %v2750_v33, %s2546_s25 }
 0x16b   : > { %v3292_v34 = vpop.permute.xlu2 %896  ;;  %v3294_v20 = vpop.permute.xlu1 %812 }
 0x16c   : > { %v3296_v18 = vpop.permute.xlu0 %810 }
 0x171   : > { %1032 = vrot.lane.b32.xlu2 %v2784_v42, %s2546_s25  ;;  %1030 = vrot.lane.b32.xlu1 %v2787_v43, %s2546_s25 }
 0x172   : > { %1028 = vrot.lane.b32.xlu0 %v2764_v37, %s2546_s25 }
 0x173   : > { %v3304_v38 = vpop.permute.xlu2 %902  ;;  %v3306_v33 = vpop.permute.xlu1 %818 }
 0x174   : > { %4470 = vst [vmem:[#allocation92_spill] sm:$0xff] %v3304_v38  ;;  %v3308_v39 = vpop.permute.xlu0 %816  ;;  %v4499_v38 = vld [vmem:[#allocation75_spill] sm:$0xff] }
 0x179   : > { %1038 = vrot.lane.b32.xlu2 %v2801_v46, %s2546_s25  ;;  %1036 = vrot.lane.b32.xlu1 %v2804_v47, %s2546_s25 }
 0x17a   : > { %1034 = vrot.lane.b32.xlu0 %v2781_v41, %s2546_s25 }
 0x17b   : > { %v3316_v42 = vpop.permute.xlu2 %908  ;;  %v3318_v37 = vpop.permute.xlu1 %824 }
 0x17c   : > { %4471 = vst [vmem:[#allocation93_spill] sm:$0xff] %v3316_v42  ;;  %v3320_v43 = vpop.permute.xlu0 %822  ;;  %v2269_v42 = vld [vmem:[%s2597_s20 + $0xca] sm:$0xff] }
 0x181   : > { %1044 = vrot.lane.b32.xlu2 %v2822_v52, %s2546_s25  ;;  %1042 = vrot.lane.b32.xlu1 %v2825_v53, %s2546_s25 }
 0x182   : > { %1040 = vrot.lane.b32.xlu0 %v2798_v45, %s2546_s25 }
 0x183   : > { %v3328_v46 = vpop.permute.xlu2 %914  ;;  %v3330_v47 = vpop.permute.xlu1 %894 }
 0x184   : > { %4472 = vst [vmem:[#allocation94_spill] sm:$0xff] %v3328_v46  ;;  %v3332_v41 = vpop.permute.xlu0 %892 }
 0x185   : > { %4473 = vst [vmem:[#allocation95_spill] sm:$0xff] %v3330_v47  ;;  %v3414_v47 = vld [vmem:[%s2597_s20 + $0x272] sm:$0xff] }
 0x186   : > { %4474 = vst [vmem:[#allocation96_spill] sm:$0xff] %v3332_v41  ;;  %v4492_v41 = vld [vmem:[#allocation64_spill] sm:$0xff] }
 0x189   : > { %1050 = vrot.lane.b32.xlu2 %v2269_v42, %s2546_s25  ;;  %1048 = vrot.lane.b32.xlu1 %v3336_v10, %s2546_s25 }
 0x18a   : > { %1046 = vrot.lane.b32.xlu0 %v2819_v51, %s2546_s25 }
 0x18b   : > { %v3343_v52 = vpop.permute.xlu2 %920  ;;  %v3345_v45 = vpop.permute.xlu1 %900 }
 0x18c   : > { %v3347_v53 = vpop.permute.xlu0 %898 }
 0x191   : > { %1056 = vrot.lane.b32.xlu2 %v2858_v2, %s2546_s25  ;;  %1054 = vrot.lane.b32.xlu1 %v2861_v5, %s2546_s25 }
 0x192   : > { %1052 = vrot.lane.b32.xlu0 %v2840_v57, %s2546_s25 }
 0x193   : > { %v3355_v42 = vpop.permute.xlu2 %926  ;;  %v3357_v46 = vpop.permute.xlu1 %906 }
 0x194   : > { %v3359_v51 = vpop.permute.xlu0 %904 }
 0x195   : > { %4476 = vst [vmem:[#allocation98_spill] sm:$0xff] %v3359_v51  ;;  %v4502_v51 = vld [vmem:[#allocation68_spill] sm:$0xff] }
 0x199   : > { %1062 = vrot.lane.b32.xlu2 %v2879_v58, %s2546_s25  ;;  %1060 = vrot.lane.b32.xlu1 %v2882_v59, %s2546_s25 }
 0x19a   : > { %1058 = vrot.lane.b32.xlu0 %v2855_v63, %s2546_s25  ;;  %v1547_v63 = vsel %vm1533_vm1, %v1514_v23, %v3110_v54  ;;  %v4482_v54 = vld [vmem:[#allocation53_spill] sm:$0xff]  ;;  %v4483_v23 = vld [vmem:[#allocation22_spill] sm:$0xff] }
 0x19b   : > { %v3367_v10 = vpop.permute.xlu2 %932  ;;  %v3369_v5 = vpop.permute.xlu1 %912  ;;  %v1580_v58 = vsel %vm1566_vm2, %v1547_v63, %v3202_v13  ;;  %v4484_v63 = vld [vmem:[#allocation58_spill] sm:$0xff] }
 0x19c   : > { %4477 = vst [vmem:[#allocation99_spill] sm:$0xff] %v3369_v5  ;;  %v3371_v57 = vpop.permute.xlu0 %910 }
 0x19d   : > { %4478 = vst [vmem:[#allocation100_spill] sm:$0xff] %v3371_v57 }
 0x1a1   : > { %1068 = vrot.lane.b32.xlu2 %v2900_v56, %s2546_s25  ;;  %1066 = vrot.lane.b32.xlu1 %v2903_v50, %s2546_s25  ;;  %v4480_v50 = vld [vmem:[#allocation27_spill] sm:$0xff] }
 0x1a2   : > { %1064 = vrot.lane.b32.xlu0 %v2876_v35, %s2546_s25  ;;  %v4481_v35 = vld [vmem:[#allocation25_spill] sm:$0xff]  ;;  %4485 = vst [vmem:[#allocation27_spill] sm:$0xff] %v3414_v47 }
 0x1a3   : > { %v3386_v60 = vpop.permute.xlu2 %938  ;;  %v919_v16 = vpop.permute.xlu1 %918  ;;  %v1516_v13 = vsel %vm1500_vm0, %v4482_v54, %v4481_v35  ;;  %v4486_v35 = vld [vmem:[#allocation29_spill] sm:$0xff]  ;;  %v4487_v54 = vld [vmem:[#allocation63_spill] sm:$0xff] }
 0x1a4   : > { %v3389_v56 = vsel %vm1599_vm3, %v1580_v58, %v919_v16  ;;  %v3391_v59 = vpop.permute.xlu0 %916  ;;  %v1549_v5 = vsel %vm1533_vm1, %v1516_v13, %v4484_v63  ;;  %v4488_v13 = vld [vmem:[#allocation31_spill] sm:$0xff] }
 0x1a5   : > { %4479 = vst [vmem:[#allocation101_spill] sm:$0xff] %v3391_v59 }
 0x1a9   : > { %1074 = vrot.lane.b32.xlu2 %v2921_v36, %s2546_s25  ;;  %1072 = vrot.lane.b32.xlu1 %v4480_v50, %s2546_s25  ;;  %v1582_v36 = vsel %vm1566_vm2, %v1549_v5, %v3252_v21  ;;  %v4489_v21 = vld [vmem:[#allocation30_spill] sm:$0xff]  ;;  %v4490_v5 = vld [vmem:[#allocation57_spill] sm:$0xff] }
 0x1aa   : > { %1070 = vrot.lane.b32.xlu0 %v4483_v23, %s2546_s25  ;;  %v1520_v23 = vsel %vm1500_vm0, %v4487_v54, %v4486_v35 }
 0x1ab   : > { %v3404_v58 = vpop.permute.xlu2 %944  ;;  %v3406_v16 = vpop.permute.xlu1 %924  ;;  %v1553_v63 = vsel %vm1533_vm1, %v1520_v23, %v3146_v40 }
 0x1ac   : > { %v923_v59 = vpop.permute.xlu0 %922  ;;  %v1586_v54 = vsel %vm1566_vm2, %v1553_v63, %v3226_v19  ;;  %v4495_v63 = vld [vmem:[#allocation12_spill] sm:$0xff] }
 0x1ad   : > { %v3411_v57 = vsel %vm1599_vm3, %v1582_v36, %v923_v59  ;;  %v1519_v59 = vsel %vm1500_vm0, %v4490_v5, %v4489_v21  ;;  %v4491_v36 = vld [vmem:[#allocation26_spill] sm:$0xff]  ;;  %v2289_v5 = vld [vmem:[%s2597_s20 + $0x38] sm:$0xff] }
 0x1ae   : > { %v1552_v35 = vsel %vm1533_vm1, %v1519_v59, %v4492_v41  ;;  %v3447_v41 = vld [vmem:[%s2597_s20 + $0x27a] sm:$0xff] }
 0x1af   : > { %v1585_v11 = vsel %vm1566_vm2, %v1552_v35, %v3264_v29  ;;  %4493 = vst [vmem:[#allocation25_spill] sm:$0xff] %v3447_v41  ;;  %v4496_v35 = vld [vmem:[#allocation33_spill] sm:$0xff] }
 0x1b1   : > { %1080 = vrot.lane.b32.xlu2 %v3414_v47, %s2546_s25  ;;  %1078 = vrot.lane.b32.xlu1 %v4488_v13, %s2546_s25 }
 0x1b2   : > { %1076 = vrot.lane.b32.xlu0 %v4491_v36, %s2546_s25  ;;  %v2288_v36 = vld [vmem:[%s2597_s20 + $0x30] sm:$0xff] }
 0x1b3   : > { %v3434_v47 = vpop.permute.xlu2 %950  ;;  %v931_v13 = vpop.permute.xlu1 %930 }
 0x1b4   : > { %v3439_v21 = vsel %vm1599_vm3, %v1586_v54, %v931_v13  ;;  %v929_v40 = vpop.permute.xlu0 %928  ;;  %v1504_v54 = vsel %vm1500_vm0, %v4496_v35, %v4495_v63  ;;  %v4497_v13 = vld [vmem:[#allocation39_spill] sm:$0xff] }
 0x1b5   : > { %v3442_v23 = vsel %vm1599_vm3, %v1585_v11, %v929_v40  ;;  %v2292_v11 = vld [vmem:[%s2597_s20 + $0x60] sm:$0xff]  ;;  %v1537_v40 = vsel %vm1533_vm1, %v1504_v54, %v4497_v13 }
 0x1b6   : > { %v1570_v35 = vsel %vm1566_vm2, %v1537_v40, %v3204_v14  ;;  %v4503_v54 = vld [vmem:[#allocation37_spill] sm:$0xff] }
 0x1b9   : > { %1150 = vrot.lane.b32.xlu2 %v2289_v5, %s2547_s26  ;;  %1148 = vrot.lane.b32.xlu1 %v2288_v36, %s2547_s26  ;;  %v4498_v5 = vld [vmem:[#allocation40_spill] sm:$0xff] }
 0x1ba   : > { %1082 = vrot.lane.b32.xlu0 %v3447_v41, %s2546_s25  ;;  %v1526_v36 = vsel %vm1500_vm0, %v4499_v38, %v4498_v5  ;;  %v4500_v41 = vld [vmem:[#allocation43_spill] sm:$0xff]  ;;  %v4504_v38 = vld [vmem:[#allocation76_spill] sm:$0xff]  ;;  %v1603_v5 = vsel %vm1599_vm3, %v1570_v35, %v3347_v53  ;;  %v4507_v35 = vld [vmem:[#allocation74_spill] sm:$0xff] }
 0x1bb   : > { %v3453_v19 = vpop.permute.xlu2 %1020  ;;  %v3455_v29 = vpop.permute.xlu1 %936  ;;  %v1559_v63 = vsel %vm1533_vm1, %v1526_v36, %v3170_v1  ;;  %v4505_v53 = vld [vmem:[#allocation48_spill] sm:$0xff] }
 0x1bc   : > { %4494 = vst [vmem:[#allocation53_spill] sm:$0xff] %v3453_v19  ;;  %v3457_v59 = vpop.permute.xlu0 %934  ;;  %v4501_v19 = vld [vmem:[#allocation41_spill] sm:$0xff]  ;;  %v1592_v13 = vsel %vm1566_vm2, %v1559_v63, %v3250_v25  ;;  %v4506_v63 = vld [vmem:[#allocation46_spill] sm:$0xff] }
 0x1bd   : > { %v1525_v12 = vsel %vm1500_vm0, %v4502_v51, %v4501_v19  ;;  %v2295_v25 = vld [vmem:[%s2597_s20 + $0x80] sm:$0xff] }
 0x1c1   : > { %1156 = vrot.lane.b32.xlu2 %v2292_v11, %s2547_s26  ;;  %1154 = vrot.lane.b32.xlu1 %v4500_v41, %s2547_s26  ;;  %v1558_v11 = vsel %vm1533_vm1, %v1525_v12, %v4504_v38 }
 0x1c2   : > { %1152 = vrot.lane.b32.xlu0 %v4503_v54, %s2547_s26  ;;  %v1591_v1 = vsel %vm1566_vm2, %v1558_v11, %v3294_v20  ;;  %v1528_v20 = vsel %vm1500_vm0, %v4507_v35, %v4506_v63  ;;  %v4508_v54 = vld [vmem:[#allocation42_spill] sm:$0xff] }
 0x1c3   : > { %v1027_v51 = vpop.permute.xlu2 %1026  ;;  %v943_v19 = vpop.permute.xlu1 %942  ;;  %v1561_v38 = vsel %vm1533_vm1, %v1528_v20, %v3127_v44  ;;  %v4510_v44 = vld [vmem:[#allocation61_spill] sm:$0xff] }
 0x1c4   : > { %v3489_v14 = vsel %vm1632_vm4, %v1603_v5, %v1027_v51  ;;  %v3492_v40 = vsel %vm1599_vm3, %v1592_v13, %v943_v19  ;;  %v941_v12 = vpop.permute.xlu0 %940  ;;  %v1594_v5 = vsel %vm1566_vm2, %v1561_v38, %v3306_v33  ;;  %v4511_v33 = vld [vmem:[#allocation47_spill] sm:$0xff] }
 0x1c5   : > { %v3495_v36 = vsel %vm1599_vm3, %v1591_v1, %v941_v12  ;;  %v2336_v1 = vld [vmem:[%s2597_s20 + $0x1e1] sm:$0xff]  ;;  %v4509_v12 = vld [vmem:[#allocation50_spill] sm:$0xff] }
 0x1c6   : > { %v2320_v38 = vld [vmem:[%s2597_s20 + $0x31] sm:$0xff] }
 0x1c9   : > { %1162 = vrot.lane.b32.xlu2 %v2295_v25, %s2547_s26  ;;  %1160 = vrot.lane.b32.xlu1 %v4505_v53, %s2547_s26  ;;  %v1532_v25 = vsel %vm1500_vm0, %v3136_v48, %v4509_v12 }
 0x1ca   : > { %1158 = vrot.lane.b32.xlu0 %v4508_v54, %s2547_s26  ;;  %v1565_v53 = vsel %vm1533_vm1, %v1532_v25, %v3194_v6  ;;  %v4514_v6 = vld [vmem:[#allocation32_spill] sm:$0xff] }
 0x1cb   : > { %v3508_v11 = vpop.permute.xlu2 %1032  ;;  %v3510_v13 = vpop.permute.xlu1 %948  ;;  %v1598_v63 = vsel %vm1566_vm2, %v1565_v53, %v3280_v27  ;;  %v4516_v27 = vld [vmem:[#allocation62_spill] sm:$0xff] }
 0x1cc   : > { %v947_v51 = vpop.permute.xlu0 %946 }
 0x1cd   : > { %v3515_v19 = vsel %vm1599_vm3, %v1594_v5, %v947_v51  ;;  %v4513_v5 = vld [vmem:[#allocation9_spill] sm:$0xff] }
 0x1ce   : > { %v1503_v51 = vsel %vm1500_vm0, %v4514_v6, %v4513_v5  ;;  %v2337_v6 = vld [vmem:[%s2597_s20 + $0x1e9] sm:$0xff] }
 0x1d1   : > { %1308 = vrot.lane.b32.xlu2 %v2336_v1, %s2548_s27  ;;  %1180 = vrot.lane.b32.xlu1 %v4510_v44, %s2547_s26  ;;  %v4515_v1 = vld [vmem:[#allocation55_spill] sm:$0xff] }
 0x1d2   : > { %1164 = vrot.lane.b32.xlu0 %v4511_v33, %s2547_s26  ;;  %v1536_v12 = vsel %vm1533_vm1, %v1503_v51, %v4515_v1  ;;  %v2352_v51 = vld [vmem:[%s2597_s20 + $0x32] sm:$0xff] }
 0x1d3   : > { %v3530_v35 = vpop.permute.xlu2 %1038  ;;  %v955_v20 = vpop.permute.xlu1 %954  ;;  %v1569_v25 = vsel %vm1566_vm2, %v1536_v12, %v3206_v9  ;;  %v2321_v12 = vld [vmem:[%s2597_s20 + $0x39] sm:$0xff] }
 0x1d4   : > { %4512 = vst [vmem:[#allocation22_spill] sm:$0xff] %v3530_v35  ;;  %v3533_v48 = vsel %vm1599_vm3, %v1598_v63, %v955_v20  ;;  %v3535_v54 = vpop.permute.xlu0 %952  ;;  %v1602_v53 = vsel %vm1599_vm3, %v1569_v25, %v3292_v34  ;;  %v4520_v25 = vld [vmem:[#allocation80_spill] sm:$0xff] }
 0x1d9   : > { %1182 = vrot.lane.b32.xlu2 %v4516_v27, %s2547_s26  ;;  %1276 = vrot.lane.b32.xlu1 %v2320_v38, %s2548_s27  ;;  %v2369_v38 = vld [vmem:[%s2597_s20 + $0x1ea] sm:$0xff] }
 0x1da   : > { %1436 = vrot.lane.b32.xlu0 %v2858_v2, %s2549_s28 }
 0x1db   : > { %v3552_v33 = vpop.permute.xlu2 %1044  ;;  %v1025_v63 = vpop.permute.xlu1 %1024 }
 0x1dc   : > { %4517 = vst [vmem:[#allocation58_spill] sm:$0xff] %v3552_v33  ;;  %v3555_v20 = vsel %vm1632_vm4, %v1602_v53, %v1025_v63  ;;  %v3557_v5 = vpop.permute.xlu0 %1022  ;;  %v4521_v53 = vld [vmem:[#allocation69_spill] sm:$0xff]  ;;  %v4524_v33 = vld [vmem:[#allocation36_spill] sm:$0xff] }
 0x1dd   : > { %4518 = vst [vmem:[#allocation29_spill] sm:$0xff] %v3557_v5  ;;  %v1522_v35 = vsel %vm1500_vm0, %v4516_v27, %v4524_v33  ;;  %v4525_v5 = vld [vmem:[#allocation70_spill] sm:$0xff] }
 0x1de   : > { %v2322_v33 = vld [vmem:[%s2597_s20 + $0x49] sm:$0xff] }
 0x1e1   : > { %1438 = vrot.lane.b32.xlu2 %v2369_v38, %s2549_s28  ;;  %1310 = vrot.lane.b32.xlu1 %v2337_v6, %s2548_s27 }
 0x1e2   : > { %1404 = vrot.lane.b32.xlu0 %v2352_v51, %s2549_s28  ;;  %v2344_v51 = vld [vmem:[%s2597_s20 + $0x241] sm:$0xff] }
 0x1e3   : > { %v1051_v2 = vpop.permute.xlu2 %1050  ;;  %v3565_v9 = vpop.permute.xlu1 %1030 }
 0x1e4   : > { %v3569_v34 = vsel %vm1632_vm4, %v3411_v57, %v1051_v2  ;;  %v3571_v1 = vpop.permute.xlu0 %1028  ;;  %v2338_v2 = vld [vmem:[%s2597_s20 + $0x1f9] sm:$0xff] }
 0x1e5   : > { %4519 = vst [vmem:[#allocation63_spill] sm:$0xff] %v3569_v34  ;;  %v2353_v34 = vld [vmem:[%s2597_s20 + $0x3a] sm:$0xff] }
 0x1e9   : > { %1196 = vrot.lane.b32.xlu2 %v4520_v25, %s2547_s26  ;;  %1184 = vrot.lane.b32.xlu1 %v4521_v53, %s2547_s26 }
 0x1ea   : > { %1278 = vrot.lane.b32.xlu0 %v2321_v12, %s2548_s27  ;;  %v1555_v12 = vsel %vm1533_vm1, %v1522_v35, %v4525_v5  ;;  %v2370_v5 = vld [vmem:[%s2597_s20 + $0x1fa] sm:$0xff] }
 0x1eb   : > { %v1057_v63 = vpop.permute.xlu2 %1056  ;;  %v3579_v38 = vpop.permute.xlu1 %1036 }
 0x1ec   : > { %4522 = vst [vmem:[#allocation31_spill] sm:$0xff] %v3579_v38  ;;  %v3583_v6 = vsel %vm1632_vm4, %v3442_v23, %v1057_v63  ;;  %v3585_v57 = vpop.permute.xlu0 %1034  ;;  %v1588_v23 = vsel %vm1566_vm2, %v1555_v12, %v3282_v31 }
 0x1ed   : > { %4523 = vst [vmem:[#allocation30_spill] sm:$0xff] %v3583_v6  ;;  %v1621_v63 = vsel %vm1599_vm3, %v1588_v23, %v3457_v59 }
 0x1f1   : > { %1324 = vrot.lane.b32.xlu2 %v2344_v51, %s2548_s27  ;;  %1312 = vrot.lane.b32.xlu1 %v2338_v2, %s2548_s27  ;;  %v4527_v51 = vld [vmem:[#allocation11_spill] sm:$0xff]  ;;  %v4528_v2 = vld [vmem:[#allocation52_spill] sm:$0xff] }
 0x1f2   : > { %1406 = vrot.lane.b32.xlu0 %v2353_v34, %s2549_s28  ;;  %v1515_v31 = vsel %vm1500_vm0, %v4528_v2, %v4527_v51  ;;  %v4529_v34 = vld [vmem:[#allocation77_spill] sm:$0xff] }
 0x1f3   : > { %v1063_v38 = vpop.permute.xlu2 %1062  ;;  %v3602_v6 = vpop.permute.xlu1 %1042  ;;  %v1548_v59 = vsel %vm1533_vm1, %v1515_v31, %v4529_v34  ;;  %v199_v31 = vld [vmem:[%s2597_s20 + $0x1b8] sm:$0xff]  ;;  %v2307_v34 = vld [vmem:[%s2597_s20 + $0x200] sm:$0xff] }
 0x1f4   : > { %4526 = vst [vmem:[#allocation57_spill] sm:$0xff] %v3602_v6  ;;  %v3605_v27 = vsel %vm1632_vm4, %v1621_v63, %v1063_v38  ;;  %v3607_v35 = vpop.permute.xlu0 %1040  ;;  %v1581_v38 = vsel %vm1566_vm2, %v1548_v59, %v3254_v26  ;;  %v198_v26 = vld [vmem:[%s2597_s20 + $0x1b0] sm:$0xff]  ;;  %v4531_v6 = vld [vmem:[#allocation24_spill] sm:$0xff] }
 0x1f5   : > { %v1614_v12 = vsel %vm1599_vm3, %v1581_v38, %v3343_v52  ;;  %v2328_v59 = vld [vmem:[%s2597_s20 + $0x91] sm:$0xff] }
 0x1f6   : > { %v4530_v52 = vld [vmem:[#allocation14_spill] sm:$0xff] }
 0x1f7   : > { %v1518_v38 = vsel %vm1500_vm0, %v199_v31, %v4530_v52  ;;  %v2360_v52 = vld [vmem:[%s2597_s20 + $0x92] sm:$0xff] }
 0x1f9   : > { %1280 = vrot.lane.b32.xlu2 %v2322_v33, %s2548_s27  ;;  %1452 = vrot.lane.b32.xlu1 %v4480_v50, %s2549_s28 }
 0x1fa   : > { %1440 = vrot.lane.b32.xlu0 %v2370_v5, %s2549_s28  ;;  %v2313_v5 = vld [vmem:[%s2597_s20 + $0x248] sm:$0xff] }
 0x1fb   : > { %v1069_v23 = vpop.permute.xlu2 %1068  ;;  %v1049_v63 = vpop.permute.xlu1 %1048 }
 0x1fc   : > { %v3626_v51 = vsel %vm1632_vm4, %v3495_v36, %v1069_v23  ;;  %v3629_v2 = vsel %vm1632_vm4, %v1614_v12, %v1049_v63  ;;  %v1047_v33 = vpop.permute.xlu0 %1046  ;;  %v1517_v36 = vsel %vm1500_vm0, %v198_v26, %v4531_v6  ;;  %v1551_v12 = vsel %vm1533_vm1, %v1518_v38, %v3129_v15  ;;  %v2354_v38 = vld [vmem:[%s2597_s20 + $0x4a] sm:$0xff] }
 0x1fd   : > { %v3634_v50 = vsel %vm1632_vm4, %v3389_v56, %v1047_v33  ;;  %v4532_v56 = vld [vmem:[#allocation81_spill] sm:$0xff]  ;;  %v1584_v63 = vsel %vm1566_vm2, %v1551_v12, %v3266_v24  ;;  %v4534_v12 = vld [vmem:[#allocation51_spill] sm:$0xff] }
 0x1fe   : > { %v1550_v23 = vsel %vm1533_vm1, %v1517_v36, %v4532_v56  ;;  %v1617_v15 = vsel %vm1599_vm3, %v1584_v63, %v3355_v42  ;;  %v4533_v42 = vld [vmem:[#allocation17_spill] sm:$0xff] }
 0x1ff   : > { %v1583_v6 = vsel %vm1566_vm2, %v1550_v23, %v3214_v62  ;;  %v2339_v62 = vld [vmem:[%s2597_s20 + $0x201] sm:$0xff]  ;;  %v1521_v36 = vsel %vm1500_vm0, %v4510_v44, %v4533_v42 }
 0x200   : > { %v1616_v26 = vsel %vm1599_vm3, %v1583_v6, %v3406_v16  ;;  %v4535_v16 = vld [vmem:[#allocation79_spill] sm:$0xff]  ;;  %v1554_v23 = vsel %vm1533_vm1, %v1521_v36, %v3144_v49 }
 0x201   : > { %1198 = vrot.lane.b32.xlu2 %v2313_v5, %s2547_s26  ;;  %1186 = vrot.lane.b32.xlu1 %v2307_v34, %s2547_s26  ;;  %v1531_v56 = vsel %vm1500_vm0, %v4535_v16, %v4534_v12  ;;  %v1587_v44 = vsel %vm1566_vm2, %v1554_v23, %v3284_v32 }
 0x202   : > { %1292 = vrot.lane.b32.xlu0 %v2328_v59, %s2548_s27 }
 0x203   : > { %v1075_v33 = vpop.permute.xlu2 %1074  ;;  %v1055_v31 = vpop.permute.xlu1 %1054 }
 0x204   : > { %v3661_v5 = vsel %vm1632_vm4, %v3515_v19, %v1075_v33  ;;  %v3664_v34 = vsel %vm1632_vm4, %v1617_v15, %v1055_v31  ;;  %v1053_v24 = vpop.permute.xlu0 %1052  ;;  %v1564_v19 = vsel %vm1533_vm1, %v1531_v56, %v3142_v30  ;;  %v1620_v30 = vsel %vm1599_vm3, %v1587_v44, %v3367_v10  ;;  %v4536_v10 = vld [vmem:[#allocation20_spill] sm:$0xff] }
 0x205   : > { %v3667_v59 = vsel %vm1632_vm4, %v1616_v26, %v1053_v24  ;;  %v1597_v63 = vsel %vm1566_vm2, %v1564_v19, %v3318_v37  ;;  %v2377_v26 = vld [vmem:[%s2597_s20 + $0x24a] sm:$0xff]  ;;  %v2371_v24 = vld [vmem:[%s2597_s20 + $0x202] sm:$0xff] }
 0x206   : > { %v1630_v6 = vsel %vm1599_vm3, %v1597_v63, %v3535_v54  ;;  %v2329_v63 = vld [vmem:[%s2597_s20 + $0x99] sm:$0xff] }
 0x209   : > { %1314 = vrot.lane.b32.xlu2 %v2339_v62, %s2548_s27  ;;  %1420 = vrot.lane.b32.xlu1 %v2360_v52, %s2549_s28  ;;  %v2345_v62 = vld [vmem:[%s2597_s20 + $0x249] sm:$0xff]  ;;  %v4537_v52 = vld [vmem:[#allocation67_spill] sm:$0xff] }
 0x20a   : > { %1408 = vrot.lane.b32.xlu0 %v2354_v38, %s2549_s28  ;;  %v1524_v54 = vsel %vm1500_vm0, %v4537_v52, %v4536_v10  ;;  %v4538_v38 = vld [vmem:[#allocation35_spill] sm:$0xff] }
 0x20b   : > { %v1081_v49 = vpop.permute.xlu2 %1080  ;;  %v1061_v15 = vpop.permute.xlu1 %1060  ;;  %v1523_v42 = vsel %vm1500_vm0, %v4521_v53, %v4538_v38  ;;  %v1557_v36 = vsel %vm1533_vm1, %v1524_v54, %v3156_v61 }
 0x20c   : > { %v3694_v33 = vsel %vm1632_vm4, %v1630_v6, %v1081_v49  ;;  %v3697_v31 = vsel %vm1632_vm4, %v1620_v30, %v1061_v15  ;;  %v1059_v32 = vpop.permute.xlu0 %1058  ;;  %v1590_v12 = vsel %vm1566_vm2, %v1557_v36, %v3296_v18  ;;  %v2323_v30 = vld [vmem:[%s2597_s20 + $0x51] sm:$0xff]  ;;  %v4539_v6 = vld [vmem:[#allocation5_spill] sm:$0xff] }
 0x20d   : > { %v3701_v37 = vsel %vm1632_vm4, %v3439_v21, %v1059_v32  ;;  %v1556_v21 = vsel %vm1533_vm1, %v1523_v42, %v3158_v55  ;;  %v1623_v56 = vsel %vm1599_vm3, %v1590_v12, %v3386_v60  ;;  %v2297_v60 = vld [vmem:[%s2597_s20 + $0x98] sm:$0xff]  ;;  %v4542_v32 = vld [vmem:[#allocation73_spill] sm:$0xff] }
 0x20e   : > { %v1589_v53 = vsel %vm1566_vm2, %v1556_v21, %v3238_v22  ;;  %v4540_v22 = vld [vmem:[#allocation38_spill] sm:$0xff]  ;;  %v4541_v15 = vld [vmem:[#allocation23_spill] sm:$0xff] }
 0x20f   : > { %v1622_v23 = vsel %vm1599_vm3, %v1589_v53, %v3455_v29  ;;  %v1505_v49 = vsel %vm1500_vm0, %v4540_v22, %v4539_v6  ;;  %v2355_v12 = vld [vmem:[%s2597_s20 + $0x52] sm:$0xff] }
 0x210   : > { %v4544_v53 = vld [vmem:[#allocation15_spill] sm:$0xff] }
 0x211   : > { %1454 = vrot.lane.b32.xlu2 %v2377_v26, %s2549_s28  ;;  %1442 = vrot.lane.b32.xlu1 %v2371_v24, %s2549_s28  ;;  %v1527_v26 = vsel %vm1500_vm0, %v4542_v32, %v4541_v15  ;;  %v4543_v24 = vld [vmem:[#allocation60_spill] sm:$0xff] }
 0x212   : > { %1326 = vrot.lane.b32.xlu0 %v2345_v62, %s2548_s27  ;;  %v1538_v29 = vsel %vm1533_vm1, %v1505_v49, %v4543_v24  ;;  %v1560_v10 = vsel %vm1533_vm1, %v1527_v26, %v3168_v4  ;;  %v2346_v32 = vld [vmem:[%s2597_s20 + $0x259] sm:$0xff]  ;;  %v2340_v26 = vld [vmem:[%s2597_s20 + $0x211] sm:$0xff] }
 0x213   : > { %v3725_v61 = vpop.permute.xlu2 %1150  ;;  %v1067_v19 = vpop.permute.xlu1 %1066  ;;  %v1571_v62 = vsel %vm1566_vm2, %v1538_v29, %v3166_v0  ;;  %v1593_v52 = vsel %vm1566_vm2, %v1560_v10, %v3308_v39  ;;  %v2361_v24 = vld [vmem:[%s2597_s20 + $0x9a] sm:$0xff]  ;;  %v1766_v29 = vld [vmem:[%s4341_s1 + $0x10] sm:$0xff] }
 0x214   : > { %v3730_v44 = vsel %vm1632_vm4, %v1623_v56, %v1067_v19  ;;  %v1065_v55 = vpop.permute.xlu0 %1064  ;;  %v1604_v54 = vsel %vm1599_vm3, %v1571_v62, %v3345_v45  ;;  %v1626_v0 = vsel %vm1599_vm3, %v1593_v52, %v3404_v58  ;;  %v1508_v58 = vsel %vm1500_vm0, %v4500_v41, %v4544_v53  ;;  %v4545_v56 = vld [vmem:[#allocation28_spill] sm:$0xff]  ;;  %v4546_v19 = vld [vmem:[#allocation78_spill] sm:$0xff] }
 0x215   : > { %v3733_v18 = vsel %vm1632_vm4, %v1622_v23, %v1065_v55  ;;  %v1637_v38 = vsel %vm1632_vm4, %v1604_v54, %v3571_v1  ;;  %v2308_v1 = vld [vmem:[%s2597_s20 + $0x210] sm:$0xff]  ;;  %v1530_v23 = vsel %vm1500_vm0, %v4546_v19, %v4545_v56  ;;  %v1765_v62 = vld [vmem:[%s4341_s1 + $0x8] sm:$0xff]  ;;  %v2309_v56 = vld [vmem:[%s2597_s20 + $0x218] sm:$0xff] }
 0x216   : > { %v4547_v55 = vld [vmem:[#allocation66_spill] sm:$0xff]  ;;  %v1563_v22 = vsel %vm1533_vm1, %v1530_v23, %v3180_v3 }
 0x217   : > { %v1596_v49 = vsel %vm1566_vm2, %v1563_v22, %v3320_v43  ;;  %v2330_v19 = vld [vmem:[%s2597_s20 + $0xa9] sm:$0xff] }
 0x218   : > { %v1629_v3 = vsel %vm1599_vm3, %v1596_v49, %v3434_v47  ;;  %v1768_v47 = vld [vmem:[%s4341_s1 + $0x20] sm:$0xf]  ;;  %v2478_v23 = vld [vmem:[%s2597_s20 + $0x48] sm:$0xff]  ;;  %v4552_v49 = vld [vmem:[#allocation59_spill] sm:$0xff] }
 0x219   : > { %1294 = vrot.lane.b32.xlu2 %v2329_v63, %s2548_s27  ;;  %1282 = vrot.lane.b32.xlu1 %v2323_v30, %s2548_s27  ;;  %v1541_v63 = vsel %vm1533_vm1, %v1508_v58, %v4547_v55  ;;  %v4548_v30 = vld [vmem:[#allocation45_spill] sm:$0xff]  ;;  %v4549_v55 = vld [vmem:[#allocation16_spill] sm:$0xff] }
 0x21a   : > { %1166 = vrot.lane.b32.xlu0 %v2297_v60, %s2547_s26  ;;  %v1529_v6 = vsel %vm1500_vm0, %v4520_v25, %v4548_v30  ;;  %2423 = vmatpush.msk.msra.mxu2 %vm1870_vm6, %v1768_v47  ;;  %v2324_v30 = vld [vmem:[%s2597_s20 + $0x61] sm:$0xff] }
 0x21b   : > { %v1157_v4 = vpop.permute.xlu2 %1156  ;;  %v1073_v42 = vpop.permute.xlu1 %1072  ;;  %v1562_v41 = vsel %vm1533_vm1, %v1529_v6, %v3182_v8  ;;  %2384 = vmatpush.msk.msra.mxu0 %vm1870_vm6, %v1768_v47  ;;  %2424 = vmatpush.msk.msra.mxu3 %vm1870_vm6, %v1768_v47  ;;  %v2479_v6 = vld [vmem:[%s2597_s20 + $0x38] sm:$0xff] }
 0x21c   : > { %v3762_v36 = vsel %vm1665_vm5, %v1637_v38, %v1157_v4  ;;  %v3765_v21 = vsel %vm1632_vm4, %v1626_v0, %v1073_v42  ;;  %v1071_v39 = vpop.permute.xlu0 %1070  ;;  %2422 = vmatpush.msk.msra.mxu1 %vm1870_vm6, %v1768_v47  ;;  %v1764_v0 = vld [vmem:[%s4341_s1] sm:$0xff]  ;;  %v2298_v4 = vld [vmem:[%s2597_s20 + $0xa8] sm:$0xff] }
 0x21d   : > { %v3769_v45 = vsel %vm1632_vm4, %v3492_v40, %v1071_v39  ;;  %v1574_v40 = vsel %vm1566_vm2, %v1541_v63, %v3178_v7  ;;  %v1595_v7 = vsel %vm1566_vm2, %v1562_v41, %v3262_v28  ;;  %v2378_v42 = vld [vmem:[%s2597_s20 + $0x25a] sm:$0xff]  ;;  %v2372_v39 = vld [vmem:[%s2597_s20 + $0x212] sm:$0xff]  ;;  %v1507_v63 = vsel %vm1500_vm0, %v2478_v23, %v4549_v55 }
 0x21e   : > { %v1607_v25 = vsel %vm1599_vm3, %v1574_v40, %v3357_v46  ;;  %v1628_v43 = vsel %vm1599_vm3, %v1595_v7, %v3510_v13  ;;  %v1767_v13 = vld [vmem:[%s4341_s1 + $0x18] sm:$0xff]  ;;  %v4550_v40 = vld [vmem:[#allocation6_spill] sm:$0xff]  ;;  %v4553_v7 = vld [vmem:[#allocation85_spill] sm:$0xff] }
 0x21f   : > { %2426 = vmatpush.msra.mxu2 %v1767_v13  ;;  %1886 = vmatpush.msra.mxu0 %v1767_v13  ;;  %v1506_v22 = vsel %vm1500_vm0, %v2479_v6, %v4550_v40  ;;  %v4551_v41 = vld [vmem:[#allocation44_spill] sm:$0xff]  ;;  %v2325_v6 = vld [vmem:[%s2597_s20 + $0x69] sm:$0xff] }
 0x220   : > { %2427 = vmatpush.msra.mxu3 %v1767_v13  ;;  %2425 = vmatpush.msra.mxu1 %v1767_v13  ;;  %v2299_v40 = vld [vmem:[%s2597_s20 + $0xb0] sm:$0xff] }
 0x221   : > { %1410 = vrot.lane.b32.xlu2 %v2355_v12, %s2549_s28  ;;  %1200 = vrot.lane.b32.xlu1 %v4535_v16, %s2547_s26  ;;  %v1640_v16 = vsel %vm1632_vm4, %v1607_v25, %v3585_v57  ;;  %v1539_v25 = vsel %vm1533_vm1, %v1506_v22, %v4552_v49  ;;  %v4557_v22 = vld [vmem:[#allocation34_spill] sm:$0xff]  ;;  %v4558_v49 = vld [vmem:[#allocation84_spill] sm:$0xff] }
 0x222   : > { %1188 = vrot.lane.b32.xlu0 %v2308_v1, %s2547_s26  ;;  %2429 = vmatpush.msra.mxu2 %v1766_v29 }
 0x223   : > { %v1163_v8 = vpop.permute.xlu2 %1162  ;;  %v1079_v60 = vpop.permute.xlu1 %1078  ;;  %1887 = vmatpush.msra.mxu0 %v1766_v29  ;;  %2430 = vmatpush.msra.mxu3 %v1766_v29 }
 0x224   : > { %v3807_v46 = vsel %vm1665_vm5, %v1640_v16, %v1163_v8  ;;  %v3810_v15 = vsel %vm1632_vm4, %v1629_v3, %v1079_v60  ;;  %v1077_v28 = vpop.permute.xlu0 %1076  ;;  %2432 = vmatpush.msra.mxu2 %v1765_v62  ;;  %2428 = vmatpush.msra.mxu1 %v1766_v29  ;;  %v1572_v3 = vsel %vm1566_vm2, %v1539_v25, %v4553_v7  ;;  %v4554_v16 = vld [vmem:[#allocation98_spill] sm:$0xff]  ;;  %v4555_v60 = vld [vmem:[#allocation92_spill] sm:$0xff] }
 0x225   : > { %v3816_v57 = vsel %vm1632_vm4, %v1628_v43, %v1077_v28  ;;  %1888 = vmatpush.msra.mxu0 %v1765_v62  ;;  %2433 = vmatpush.msra.mxu3 %v1765_v62  ;;  %v1605_v43 = vsel %vm1599_vm3, %v1572_v3, %v4555_v60  ;;  %v2362_v29 = vld [vmem:[%s2597_s20 + $0xaa] sm:$0xff] }
 0x226   : > { %2435 = vmatpush.msra.mxu2 %v1764_v0  ;;  %2431 = vmatpush.msra.mxu1 %v1765_v62  ;;  %v1638_v13 = vsel %vm1632_vm4, %v1605_v43, %v3565_v9  ;;  %v2356_v62 = vld [vmem:[%s2597_s20 + $0x62] sm:$0xff] }
 0x227   : > { %1889 = vmatpush.msra.mxu0 %v1764_v0  ;;  %2436 = vmatpush.msra.mxu3 %v1764_v0 }
 0x228   : > { %2434 = vmatpush.msra.mxu1 %v1764_v0 }
 0x229   : > { %1328 = vrot.lane.b32.xlu2 %v2346_v32, %s2548_s27  ;;  %1316 = vrot.lane.b32.xlu1 %v2340_v26, %s2548_s27 }
 0x22a   : > { %1422 = vrot.lane.b32.xlu0 %v2361_v24, %s2549_s28 }
 0x22b   : > { %v3833_v10 = vpop.permute.xlu2 %1308  ;;  %v3835_v52 = vpop.permute.xlu1 %1148 }
 0x22c   : > { %v1083_v54 = vpop.permute.xlu0 %1082 }
 0x22d   : > { %v3842_v38 = vsel %vm1632_vm4, %v3533_v48, %v1083_v54  ;;  %v2315_v54 = vld [vmem:[%s2597_s20 + $0x260] sm:$0xff] }
 0x231   : > { %1168 = vrot.lane.b32.xlu2 %v2298_v4, %s2547_s26  ;;  %1456 = vrot.lane.b32.xlu1 %v2378_v42, %s2549_s28  ;;  %v2373_v4 = vld [vmem:[%s2597_s20 + $0x21a] sm:$0xff] }
 0x232   : > { %1444 = vrot.lane.b32.xlu0 %v2372_v39, %s2549_s28  ;;  %v2347_v42 = vld [vmem:[%s2597_s20 + $0x261] sm:$0xff]  ;;  %v2341_v39 = vld [vmem:[%s2597_s20 + $0x219] sm:$0xff] }
 0x233   : > { %v3850_v48 = vpop.permute.xlu2 %1182  ;;  %v1155_v12 = vpop.permute.xlu1 %1154 }
 0x234   : > { %v3854_v53 = vsel %vm1665_vm5, %v3489_v14, %v1155_v12  ;;  %v1153_v58 = vpop.permute.xlu0 %1152  ;;  %v1540_v14 = vsel %vm1533_vm1, %v1507_v63, %v4551_v41  ;;  %v4556_v63 = vld [vmem:[#allocation10_spill] sm:$0xff] }
 0x235   : > { %v3858_v1 = vsel %vm1665_vm5, %v3555_v20, %v1153_v58  ;;  %v1573_v20 = vsel %vm1566_vm2, %v1540_v14, %v3216_v17  ;;  %v182_v58 = vld [vmem:[%s2597_s20] sm:$0xff] }
 0x236   : > { %v1606_v8 = vsel %vm1599_vm3, %v1573_v20, %v4554_v16  ;;  %v2379_v14 = vld [vmem:[%s2597_s20 + $0x262] sm:$0xff]  ;;  %v4559_v20 = vld [vmem:[#allocation96_spill] sm:$0xff] }
 0x237   : > { %v1639_v28 = vsel %vm1632_vm4, %v1606_v8, %v3508_v11  ;;  %v1683_v8 = vsel %vm1665_vm5, %v3664_v34, %v3850_v48  ;;  %v2316_v34 = vld [vmem:[%s2597_s20 + $0x270] sm:$0xff] }
 0x238   : > { %v2331_v48 = vld [vmem:[%s2597_s20 + $0xb1] sm:$0xff] }
 0x239   : > { %1190 = vrot.lane.b32.xlu2 %v2309_v56, %s2547_s26  ;;  %1296 = vrot.lane.b32.xlu1 %v2330_v19, %s2548_s27 }
 0x23a   : > { %1284 = vrot.lane.b32.xlu0 %v2324_v30, %s2548_s27  ;;  %v1501_v30 = vsel %vm1500_vm0, %v182_v58, %v4556_v63  ;;  %v4562_v58 = vld [vmem:[#allocation56_spill] sm:$0xff]  ;;  %v4564_v63 = vld [vmem:[#allocation95_spill] sm:$0xff] }
 0x23b   : > { %v1439_v17 = vpop.permute.xlu2 %1438  ;;  %v1161_v47 = vpop.permute.xlu1 %1160  ;;  %v1534_v41 = vsel %vm1533_vm1, %v1501_v30, %v4557_v22 }
 0x23c   : > { %v3889_v32 = vsel %vm1665_vm5, %v1639_v28, %v1161_v47  ;;  %v1159_v26 = vpop.permute.xlu0 %1158  ;;  %v1567_v25 = vsel %vm1566_vm2, %v1534_v41, %v4558_v49 }
 0x23d   : > { %v3892_v24 = vsel %vm1665_vm5, %v1638_v13, %v1159_v26  ;;  %v1600_v7 = vsel %vm1599_vm3, %v1567_v25, %v4559_v20 }
 0x241   : > { %1424 = vrot.lane.b32.xlu2 %v2362_v29, %s2549_s28  ;;  %1412 = vrot.lane.b32.xlu1 %v2356_v62, %s2549_s28  ;;  %v183_v62 = vld [vmem:[%s2597_s20 + $0x8] sm:$0xff] }
 0x242   : > { %1202 = vrot.lane.b32.xlu0 %v2315_v54, %s2547_s26 }
 0x243   : > { %v3900_v11 = vpop.permute.xlu2 %1196  ;;  %v1181_v9 = vpop.permute.xlu1 %1180 }
 0x244   : > { %v3902_v0 = vpop.permute.xlu0 %1164  ;;  %v1682_v12 = vsel %vm1665_vm5, %v3667_v59, %v1181_v9 }
 0x245   : > { %v1715_v55 = vsel %vm1698_vm7, %v1682_v12, %v3833_v10  ;;  %v4560_v10 = vld [vmem:[#allocation53_spill] sm:$0xff]  ;;  %v2363_v12 = vld [vmem:[%s2597_s20 + $0xb2] sm:$0xff] }
 0x246   : > { %v1633_v3 = vsel %vm1632_vm4, %v1600_v7, %v4560_v10  ;;  %v2374_v7 = vld [vmem:[%s2597_s20 + $0x22a] sm:$0xff]  ;;  %v4566_v10 = vld [vmem:[#allocation27_spill] sm:$0xff] }
 0x247   : > { %v1666_v16 = vsel %vm1665_vm5, %v1633_v3, %v3835_v52  ;;  %v2310_v52 = vld [vmem:[%s2597_s20 + $0x228] sm:$0xff]  ;;  %v4567_v3 = vld [vmem:[#allocation91_spill] sm:$0xff] }
 0x249   : > { %1446 = vrot.lane.b32.xlu2 %v2373_v4, %s2549_s28  ;;  %1330 = vrot.lane.b32.xlu1 %v2347_v42, %s2548_s27 }
 0x24a   : > { %1318 = vrot.lane.b32.xlu0 %v2341_v39, %s2548_s27  ;;  %v2342_v39 = vld [vmem:[%s2597_s20 + $0x229] sm:$0xff] }
 0x24b   : > { %v3913_v56 = vpop.permute.xlu2 %1324  ;;  %v1277_v19 = vpop.permute.xlu1 %1276 }
 0x24c   : > { %v1437_v23 = vpop.permute.xlu0 %1436  ;;  %v1699_v28 = vsel %vm1698_vm7, %v1666_v16, %v1277_v19 }
 0x24d   : > { %v1748_v59 = vsel %vm1731_vm8, %v1715_v55, %v1437_v23  ;;  %v2357_v23 = vld [vmem:[%s2597_s20 + $0x6a] sm:$0xff] }
 0x24e   : > { %2401 = vmatmul.msk.f32.vlgmr.msra.gmra.mxu2 %vm1773_vm9, %v1748_v59  ;;  %v4563_v55 = vld [vmem:[#allocation82_spill] sm:$0xff] }
 0x251   : > { %1286 = vrot.lane.b32.xlu2 %v2325_v6, %s2548_s27  ;;  %1170 = vrot.lane.b32.xlu1 %v2299_v40, %s2547_s26  ;;  %v4565_v6 = vld [vmem:[#allocation29_spill] sm:$0xff] }
 0x252   : > { %1458 = vrot.lane.b32.xlu0 %v2379_v14, %s2549_s28 }
 0x253   : > { %v3940_v60 = vpop.permute.xlu2 %1280  ;;  %v1311_v43 = vpop.permute.xlu1 %1310 }
 0x254   : > { %v1716_v47 = vsel %vm1698_vm7, %v1683_v8, %v1311_v43  ;;  %v1405_v13 = vpop.permute.xlu0 %1404  ;;  %v4568_v8 = vld [vmem:[#allocation30_spill] sm:$0xff] }
 0x255   : > { %v1732_v26 = vsel %vm1731_vm8, %v1699_v28, %v1405_v13  ;;  %v1749_v29 = vsel %vm1731_vm8, %v1716_v47, %v1439_v17  ;;  %v4561_v17 = vld [vmem:[#allocation13_spill] sm:$0xff] }
 0x256   : > { %2385 = vmatmul.msk.f32.vlgmr.msra.gmra.mxu0 %vm1773_vm9, %v1732_v26  ;;  %2402 = vmatmul.msk.f32.gmra.mxu2 %vm1773_vm9, %v1749_v29  ;;  %v1502_v42 = vsel %vm1500_vm0, %v183_v62, %v4561_v17 }
 0x257   : > { %v1535_v19 = vsel %vm1533_vm1, %v1502_v42, %v4562_v58  ;;  %v4570_v42 = vld [vmem:[#allocation65_spill] sm:$0xff]  ;;  %v2317_v58 = vld [vmem:[%s2597_s20 + $0x278] sm:$0xff] }
 0x258   : > { %v1568_v59 = vsel %vm1566_vm2, %v1535_v19, %v4563_v55  ;;  %v4571_v19 = vld [vmem:[#allocation87_spill] sm:$0xff] }
 0x259   : > { %1204 = vrot.lane.b32.xlu2 %v2316_v34, %s2547_s26  ;;  %1192 = vrot.lane.b32.xlu1 %v2310_v52, %s2547_s26  ;;  %v1601_v30 = vsel %vm1599_vm3, %v1568_v59, %v4564_v63  ;;  %v2300_v34 = vld [vmem:[%s2597_s20 + $0xc0] sm:$0xff]  ;;  %v2311_v55 = vld [vmem:[%s2597_s20 + $0x230] sm:$0xff] }
 0x25a   : > { %1298 = vrot.lane.b32.xlu0 %v2331_v48, %s2548_s27  ;;  %v1634_v40 = vsel %vm1632_vm4, %v1601_v30, %v4565_v6  ;;  %v4572_v59 = vld [vmem:[#allocation93_spill] sm:$0xff]  ;;  %v4573_v30 = vld [vmem:[#allocation31_spill] sm:$0xff] }
 0x25b   : > { %v3955_v54 = vpop.permute.xlu2 %1198  ;;  %v1185_v9 = vpop.permute.xlu1 %1184  ;;  %v1667_v22 = vsel %vm1665_vm5, %v1634_v40, %v3725_v61  ;;  %v1690_v61 = vsel %vm1665_vm5, %v3626_v51, %v3900_v11  ;;  %v2332_v11 = vld [vmem:[%s2597_s20 + $0xc1] sm:$0xff] }
 0x25c   : > { %v1279_v4 = vpop.permute.xlu0 %1278  ;;  %v1723_v16 = vsel %vm1698_vm7, %v1690_v61, %v3913_v56  ;;  %v1684_v43 = vsel %vm1665_vm5, %v4568_v8, %v1185_v9  ;;  %v2326_v56 = vld [vmem:[%s2597_s20 + $0x79] sm:$0xff] }
 0x25d   : > { %v1700_v49 = vsel %vm1698_vm7, %v1667_v22, %v1279_v4  ;;  %v2480_v9 = vld [vmem:[%s2597_s20 + $0x60] sm:$0xff]  ;;  %v4569_v4 = vld [vmem:[#allocation7_spill] sm:$0xff] }
 0x25e   : > { %v1509_v17 = vsel %vm1500_vm0, %v2480_v9, %v4569_v4  ;;  %v2481_v4 = vld [vmem:[%s2597_s20 + $0x68] sm:$0xff] }
 0x261   : > { %1320 = vrot.lane.b32.xlu2 %v2342_v39, %s2548_s27  ;;  %1426 = vrot.lane.b32.xlu1 %v2363_v12, %s2549_s28  ;;  %v1542_v39 = vsel %vm1533_vm1, %v1509_v17, %v4570_v42  ;;  %v2358_v12 = vld [vmem:[%s2597_s20 + $0x7a] sm:$0xff] }
 0x262   : > { %1414 = vrot.lane.b32.xlu0 %v2357_v23, %s2549_s28  ;;  %v1575_v23 = vsel %vm1566_vm2, %v1542_v39, %v4571_v19  ;;  %v4578_v39 = vld [vmem:[#allocation49_spill] sm:$0xff]  ;;  %v4579_v19 = vld [vmem:[#allocation86_spill] sm:$0xff] }
 0x263   : > { %v1315_v41 = vpop.permute.xlu2 %1314  ;;  %v1313_v14 = vpop.permute.xlu1 %1312  ;;  %v1608_v63 = vsel %vm1599_vm3, %v1575_v23, %v4572_v59  ;;  %v4580_v59 = vld [vmem:[#allocation100_spill] sm:$0xff] }
 0x264   : > { %v1407_v25 = vpop.permute.xlu0 %1406  ;;  %v1717_v13 = vsel %vm1698_vm7, %v1684_v43, %v1313_v14  ;;  %v1641_v6 = vsel %vm1632_vm4, %v1608_v63, %v4573_v30  ;;  %v1691_v43 = vsel %vm1665_vm5, %v3769_v45, %v3955_v54  ;;  %v4576_v45 = vld [vmem:[#allocation25_spill] sm:$0xff] }
 0x265   : > { %v1733_v20 = vsel %vm1731_vm8, %v1700_v49, %v1407_v25  ;;  %v1674_v40 = vsel %vm1665_vm5, %v1641_v6, %v3902_v0  ;;  %v1701_v25 = vsel %vm1698_vm7, %v3858_v1, %v3940_v60  ;;  %v2343_v0 = vld [vmem:[%s2597_s20 + $0x231] sm:$0xff]  ;;  %v4575_v1 = vld [vmem:[#allocation97_spill] sm:$0xff] }
 0x266   : > { %2386 = vmatmul.msk.f32.gmra.mxu0 %vm1773_vm9, %v1733_v20  ;;  %v2359_v30 = vld [vmem:[%s2597_s20 + $0x82] sm:$0xff]  ;;  %v4581_v6 = vld [vmem:[#allocation22_spill] sm:$0xff] }
 0x269   : > { %1460 = vrot.lane.b32.xlu2 %v4566_v10, %s2549_s28  ;;  %1448 = vrot.lane.b32.xlu1 %v2374_v7, %s2549_s28 }
 0x26a   : > { %1332 = vrot.lane.b32.xlu0 %v4567_v3, %s2548_s27  ;;  %v4574_v3 = vld [vmem:[#allocation90_spill] sm:$0xff] }
 0x26b   : > { %v1455_v28 = vpop.permute.xlu2 %1454  ;;  %v1453_v47 = vpop.permute.xlu1 %1452 }
 0x26c   : > { %v1441_v26 = vpop.permute.xlu0 %1440  ;;  %v1756_v29 = vsel %vm1731_vm8, %v1723_v16, %v1453_v47 }
 0x26d   : > { %v1750_v51 = vsel %vm1731_vm8, %v1717_v13, %v1441_v26  ;;  %2409 = vmatmul.msk.f32.vlgmr.msra.gmra.mxu3 %vm1773_vm9, %v1756_v29  ;;  %v2301_v29 = vld [vmem:[%s2597_s20 + $0xc8] sm:$0xff] }
 0x26e   : > { %2403 = vmatmul.msk.f32.gmra.mxu2 %vm1773_vm9, %v1750_v51 }
 0x271   : > { %1300 = vrot.lane.b32.xlu2 %v2332_v11, %s2548_s27  ;;  %1288 = vrot.lane.b32.xlu1 %v2326_v56, %s2548_s27 }
 0x272   : > { %1172 = vrot.lane.b32.xlu0 %v2300_v34, %s2547_s26  ;;  %v2318_v34 = vld [vmem:[%s2597_s20 + $0x288] sm:$0xff] }
 0x273   : > { %v4002_v52 = vpop.permute.xlu2 %1294  ;;  %v1187_v48 = vpop.permute.xlu1 %1186 }
 0x274   : > { %v1293_v62 = vpop.permute.xlu0 %1292  ;;  %v1685_v61 = vsel %vm1665_vm5, %v3701_v37, %v1187_v48  ;;  %v2333_v48 = vld [vmem:[%s2597_s20 + $0xc9] sm:$0xff] }
 0x275   : > { %v1707_v22 = vsel %vm1698_vm7, %v1674_v40, %v1293_v62  ;;  %v1718_v8 = vsel %vm1698_vm7, %v1685_v61, %v1315_v41  ;;  %v2375_v41 = vld [vmem:[%s2597_s20 + $0x232] sm:$0xff]  ;;  %v2327_v62 = vld [vmem:[%s2597_s20 + $0x81] sm:$0xff] }
 0x279   : > { %1416 = vrot.lane.b32.xlu2 %v2358_v12, %s2549_s28  ;;  %1206 = vrot.lane.b32.xlu1 %v2317_v58, %s2547_s26 }
 0x27a   : > { %1194 = vrot.lane.b32.xlu0 %v2311_v55, %s2547_s26  ;;  %v2350_v55 = vld [vmem:[%s2597_s20 + $0x289] sm:$0xff] }
 0x27b   : > { %v1411_v14 = vpop.permute.xlu2 %1410  ;;  %v1421_v49 = vpop.permute.xlu1 %1420 }
 0x27c   : > { %v1409_v20 = vpop.permute.xlu0 %1408  ;;  %v1740_v7 = vsel %vm1731_vm8, %v1707_v22, %v1421_v49 }
 0x27d   : > { %v1734_v10 = vsel %vm1731_vm8, %v1701_v25, %v1409_v20  ;;  %2393 = vmatmul.msk.f32.vlgmr.msra.gmra.mxu1 %vm1773_vm9, %v1740_v7 }
 0x27e   : > { %2387 = vmatmul.msk.f32.gmra.mxu0 %vm1773_vm9, %v1734_v10  ;;  %v2302_v10 = vld [vmem:[%s2597_s20 + $0xd8] sm:$0xff] }
 0x281   : > { %1334 = vrot.lane.b32.xlu2 %v4574_v3, %s2548_s27  ;;  %1322 = vrot.lane.b32.xlu1 %v2343_v0, %s2548_s27  ;;  %v2334_v0 = vld [vmem:[%s2597_s20 + $0xd9] sm:$0xff]  ;;  %v2382_v3 = vld [vmem:[%s2597_s20 + $0x28a] sm:$0xff] }
 0x282   : > { %1428 = vrot.lane.b32.xlu0 %v4575_v1, %s2549_s28 }
 0x283   : > { %v1329_v60 = vpop.permute.xlu2 %1328  ;;  %v1443_v16 = vpop.permute.xlu1 %1442 }
 0x284   : > { %v1327_v47 = vpop.permute.xlu0 %1326  ;;  %v1751_v13 = vsel %vm1731_vm8, %v1718_v8, %v1443_v16 }
 0x285   : > { %v1724_v37 = vsel %vm1698_vm7, %v1691_v43, %v1327_v47  ;;  %2404 = vmatmul.msk.f32.gmra.mxu2 %vm1773_vm9, %v1751_v13 }
 0x286   : > { %v1757_v26 = vsel %vm1731_vm8, %v1724_v37, %v1455_v28  ;;  %v2483_v37 = vld [vmem:[%s2597_s20 + $0x78] sm:$0xff] }
 0x287   : > { %2410 = vmatmul.msk.f32.gmra.mxu3 %vm1773_vm9, %v1757_v26  ;;  %v4582_v26 = vld [vmem:[#allocation18_spill] sm:$0xff] }
 0x289   : > { %1174 = vrot.lane.b32.xlu2 %v2301_v29, %s2547_s26  ;;  %1462 = vrot.lane.b32.xlu1 %v4576_v45, %s2549_s28  ;;  %v1511_v29 = vsel %vm1500_vm0, %v2483_v37, %v4582_v26  ;;  %v4583_v45 = vld [vmem:[#allocation72_spill] sm:$0xff] }
 0x28a   : > { %1450 = vrot.lane.b32.xlu0 %v2375_v41, %s2549_s28  ;;  %v2366_v41 = vld [vmem:[%s2597_s20 + $0xda] sm:$0xff] }
 0x28b   : > { %v4054_v54 = vpop.permute.xlu2 %1168  ;;  %v1283_v51 = vpop.permute.xlu1 %1282 }
 0x28c   : > { %v1702_v11 = vsel %vm1698_vm7, %v3854_v53, %v1283_v51  ;;  %v1167_v56 = vpop.permute.xlu0 %1166  ;;  %v4577_v53 = vld [vmem:[#allocation19_spill] sm:$0xff] }
 0x28d   : > { %v1735_v28 = vsel %vm1731_vm8, %v1702_v11, %v1411_v14  ;;  %v1510_v17 = vsel %vm1500_vm0, %v2481_v4, %v4577_v53  ;;  %v2482_v14 = vld [vmem:[%s2597_s20 + $0xca] sm:$0xff]  ;;  %v4584_v11 = vld [vmem:[#allocation83_spill] sm:$0xff] }
 0x28e   : > { %2388 = vmatmul.msk.f32.gmra.mxu0 %vm1773_vm9, %v1735_v28  ;;  %v1543_v12 = vsel %vm1533_vm1, %v1510_v17, %v4578_v39  ;;  %v2319_v51 = vld [vmem:[%s2597_s20 + $0x290] sm:$0xff]  ;;  %v2303_v39 = vld [vmem:[%s2597_s20 + $0xe0] sm:$0xff] }
 0x28f   : > { %v1576_v23 = vsel %vm1566_vm2, %v1543_v12, %v4579_v19  ;;  %v4585_v28 = vld [vmem:[#allocation99_spill] sm:$0xff]  ;;  %v2335_v12 = vld [vmem:[%s2597_s20 + $0xe1] sm:$0xff] }
 0x290   : > { %v1609_v63 = vsel %vm1599_vm3, %v1576_v23, %v4580_v59  ;;  %v2383_v19 = vld [vmem:[%s2597_s20 + $0x292] sm:$0xff] }
 0x291   : > { %1208 = vrot.lane.b32.xlu2 %v2318_v34, %s2547_s26  ;;  %1302 = vrot.lane.b32.xlu1 %v2333_v48, %s2548_s27  ;;  %v1642_v40 = vsel %vm1632_vm4, %v1609_v63, %v4581_v6  ;;  %v2367_v63 = vld [vmem:[%s2597_s20 + $0xe2] sm:$0xff] }
 0x292   : > { %1290 = vrot.lane.b32.xlu0 %v2327_v62, %s2548_s27  ;;  %v1675_v22 = vsel %vm1665_vm5, %v1642_v40, %v1167_v56 }
 0x293   : > { %v1201_v9 = vpop.permute.xlu1 %1200  ;;  %v4071_v58 = vpop.permute.xlu2 %1190  ;;  %v1708_v20 = vsel %vm1698_vm7, %v1675_v22, %v4002_v52 }
 0x294   : > { %v1189_v42 = vpop.permute.xlu0 %1188  ;;  %v1692_v1 = vsel %vm1665_vm5, %v3765_v21, %v1201_v9  ;;  %v1687_v6 = vsel %vm1665_vm5, %v3605_v27, %v4071_v58 }
 0x295   : > { %v1686_v52 = vsel %vm1665_vm5, %v3697_v31, %v1189_v42  ;;  %v1725_v8 = vsel %vm1698_vm7, %v1692_v1, %v1329_v60  ;;  %v2351_v31 = vld [vmem:[%s2597_s20 + $0x291] sm:$0xff]  ;;  %v1544_v60 = vsel %vm1533_vm1, %v1511_v29, %v4583_v45 }
 0x296   : > { %v1577_v56 = vsel %vm1566_vm2, %v1544_v60, %v4584_v11 }
 0x297   : > { %v1610_v34 = vsel %vm1599_vm3, %v1577_v56, %v4585_v28 }
 0x298   : > { %v1643_v62 = vsel %vm1632_vm4, %v1610_v34, %v3607_v35 }
 0x299   : > { %1336 = vrot.lane.b32.xlu2 %v2350_v55, %s2548_s27  ;;  %1430 = vrot.lane.b32.xlu1 %v2482_v14, %s2549_s28  ;;  %v1676_v9 = vsel %vm1665_vm5, %v1643_v62, %v4054_v54 }
 0x29a   : > { %1418 = vrot.lane.b32.xlu0 %v2359_v30, %s2549_s28 }
 0x29b   : > { %v1317_v49 = vpop.permute.xlu1 %1316  ;;  %v1425_v61 = vpop.permute.xlu2 %1424 }
 0x29c   : > { %v1423_v25 = vpop.permute.xlu0 %1422  ;;  %v1719_v43 = vsel %vm1698_vm7, %v1686_v52, %v1317_v49  ;;  %v4587_v52 = vld [vmem:[#allocation71_spill] sm:$0xff] }
 0x29d   : > { %v1741_v7 = vsel %vm1731_vm8, %v1708_v20, %v1423_v25 }
 0x29e   : > { %2394 = vmatmul.msk.f32.gmra.mxu1 %vm1773_vm9, %v1741_v7 }
 0x2a1   : > { %1176 = vrot.lane.b32.xlu1 %v2302_v10, %s2547_s26  ;;  %1304 = vrot.lane.b32.xlu2 %v2334_v0, %s2548_s27 }
 0x2a2   : > { %1464 = vrot.lane.b32.xlu0 %v2382_v3, %s2549_s28  ;;  %v4586_v3 = vld [vmem:[#allocation8_spill] sm:$0xff] }
 0x2a3   : > { %v1457_v16 = vpop.permute.xlu1 %1456  ;;  %v1447_v48 = vpop.permute.xlu2 %1446 }
 0x2a4   : > { %v1445_v47 = vpop.permute.xlu0 %1444  ;;  %v1758_v13 = vsel %vm1731_vm8, %v1725_v8, %v1457_v16  ;;  %v4588_v8 = vld [vmem:[#allocation89_spill] sm:$0xff] }
 0x2a5   : > { %v1752_v21 = vsel %vm1731_vm8, %v1719_v43, %v1445_v47  ;;  %2411 = vmatmul.msk.f32.gmra.mxu3 %vm1773_vm9, %v1758_v13  ;;  %v4589_v43 = vld [vmem:[#allocation94_spill] sm:$0xff] }
 0x2a6   : > { %2405 = vmatmul.msk.f32.gmra.mxu2 %vm1773_vm9, %v1752_v21  ;;  %v4590_v21 = vld [vmem:[#allocation57_spill] sm:$0xff] }
 0x2a9   : > { %1432 = vrot.lane.b32.xlu1 %v2366_v41, %s2549_s28  ;;  %1338 = vrot.lane.b32.xlu2 %v2351_v31, %s2548_s27 }
 0x2aa   : > { %1210 = vrot.lane.b32.xlu0 %v2319_v51, %s2547_s26 }
 0x2ab   : > { %v1297_v4 = vpop.permute.xlu1 %1296  ;;  %v1287_v35 = vpop.permute.xlu2 %1286 }
 0x2ac   : > { %v1709_v53 = vsel %vm1698_vm7, %v1676_v9, %v1297_v4  ;;  %v1285_v17 = vpop.permute.xlu0 %1284  ;;  %v1704_v29 = vsel %vm1698_vm7, %v3892_v24, %v1287_v35 }
 0x2ad   : > { %v1742_v42 = vsel %vm1731_vm8, %v1709_v53, %v1425_v61  ;;  %v1703_v54 = vsel %vm1698_vm7, %v3762_v36, %v1285_v17  ;;  %v2484_v61 = vld [vmem:[%s2597_s20 + $0x80] sm:$0xff] }
 0x2ae   : > { %2395 = vmatmul.msk.f32.gmra.mxu1 %vm1773_vm9, %v1742_v42  ;;  %v1512_v1 = vsel %vm1500_vm0, %v2484_v61, %v4586_v3 }
 0x2af   : > { %v1545_v16 = vsel %vm1533_vm1, %v1512_v1, %v4587_v52 }
 0x2b1   : > { %1178 = vrot.lane.b32.xlu1 %v2303_v39, %s2547_s26  ;;  %1306 = vrot.lane.b32.xlu2 %v2335_v12, %s2548_s27  ;;  %v2485_v39 = vld [vmem:[%s2597_s20 + $0x90] sm:$0xff]  ;;  %v4591_v12 = vld [vmem:[#allocation21_spill] sm:$0xff] }
 0x2b2   : > { %1466 = vrot.lane.b32.xlu0 %v2383_v19, %s2549_s28  ;;  %v1513_v19 = vsel %vm1500_vm0, %v2485_v39, %v4591_v12 }
 0x2b3   : > { %v1413_v23 = vpop.permute.xlu1 %1412  ;;  %v1205_v22 = vpop.permute.xlu2 %1204 }
 0x2b4   : > { %v1203_v55 = vpop.permute.xlu0 %1202  ;;  %v1736_v59 = vsel %vm1731_vm8, %v1703_v54, %v1413_v23  ;;  %v1694_v24 = vsel %vm1665_vm5, %v3816_v57, %v1205_v22  ;;  %v4592_v23 = vld [vmem:[#allocation54_spill] sm:$0xff] }
 0x2b5   : > { %2389 = vmatmul.msk.f32.gmra.mxu0 %vm1773_vm9, %v1736_v59  ;;  %v1693_v49 = vsel %vm1665_vm5, %v3661_v5, %v1203_v55  ;;  %v1578_v5 = vsel %vm1566_vm2, %v1545_v16, %v4588_v8  ;;  %v1546_v55 = vsel %vm1533_vm1, %v1513_v19, %v4592_v23  ;;  %v4593_v59 = vld [vmem:[#allocation88_spill] sm:$0xff] }
 0x2b6   : > { %v1611_v47 = vsel %vm1599_vm3, %v1578_v5, %v4589_v43 }
 0x2b7   : > { %v1644_v37 = vsel %vm1632_vm4, %v1611_v47, %v4590_v21 }
 0x2ba   : > { %1434 = vrot.lane.b32.xlu0 %v2367_v63, %s2549_s28  ;;  %v1579_v63 = vsel %vm1566_vm2, %v1546_v55, %v4593_v59 }
 0x2bb   : > { %v1331_v30 = vpop.permute.xlu1 %1330  ;;  %v1321_v27 = vpop.permute.xlu2 %1320 }
 0x2bc   : > { %v1319_v40 = vpop.permute.xlu0 %1318  ;;  %v1726_v20 = vsel %vm1698_vm7, %v1693_v49, %v1331_v30  ;;  %v4594_v30 = vld [vmem:[#allocation101_spill] sm:$0xff] }
 0x2bd   : > { %v1720_v14 = vsel %vm1698_vm7, %v1687_v6, %v1319_v40  ;;  %v1612_v6 = vsel %vm1599_vm3, %v1579_v63, %v4594_v30  ;;  %v4595_v40 = vld [vmem:[#allocation58_spill] sm:$0xff] }
 0x2be   : > { %v1753_v36 = vsel %vm1731_vm8, %v1720_v14, %v1447_v48  ;;  %v1645_v22 = vsel %vm1632_vm4, %v1612_v6, %v4595_v40  ;;  %v4247_v40 = vld [vmem:[%s4342_s2] ss:$0 sm:$0xff] }
 0x2bf   : > { %2406 = vmatmul.msk.f32.gmra.mxu2 %vm1773_vm9, %v1753_v36 }
 0x2c3   : > { %v1171_v25 = vpop.permute.xlu1 %1170  ;;  %v1461_v13 = vpop.permute.xlu2 %1460 }
 0x2c4   : > { %v1459_v7 = vpop.permute.xlu0 %1458  ;;  %v1677_v26 = vsel %vm1665_vm5, %v1644_v37, %v1171_v25 }
 0x2c5   : > { %v1759_v10 = vsel %vm1731_vm8, %v1726_v20, %v1459_v7 }
 0x2c6   : > { %2412 = vmatmul.msk.f32.gmra.mxu3 %vm1773_vm9, %v1759_v10 }
 0x2cb   : > { %v1193_v58 = vpop.permute.xlu1 %1192  ;;  %v1301_v56 = vpop.permute.xlu2 %1300 }
 0x2cc   : > { %v1299_v0 = vpop.permute.xlu0 %1298  ;;  %v1688_v11 = vsel %vm1665_vm5, %v3733_v18, %v1193_v58 }
 0x2cd   : > { %v1710_v41 = vsel %vm1698_vm7, %v1677_v26, %v1299_v0  ;;  %v1721_v48 = vsel %vm1698_vm7, %v1688_v11, %v1321_v27 }
 0x2d3   : > { %v1427_v31 = vpop.permute.xlu1 %1426  ;;  %v1417_v17 = vpop.permute.xlu2 %1416 }
 0x2d4   : > { %v1415_v45 = vpop.permute.xlu0 %1414  ;;  %v1743_v51 = vsel %vm1731_vm8, %v1710_v41, %v1427_v31 }
 0x2d5   : > { %v1737_v60 = vsel %vm1731_vm8, %v1704_v29, %v1415_v45  ;;  %2396 = vmatmul.msk.f32.gmra.mxu1 %vm1773_vm9, %v1743_v51 }
 0x2d6   : > { %2390 = vmatmul.msk.f32.gmra.mxu0 %vm1773_vm9, %v1737_v60 }
 0x2db   : > { %v1449_v28 = vpop.permute.xlu1 %1448 }
 0x2dc   : > { %v1333_v34 = vpop.permute.xlu0 %1332  ;;  %v1754_v9 = vsel %vm1731_vm8, %v1721_v48, %v1449_v28 }
 0x2dd   : > { %v1727_v62 = vsel %vm1698_vm7, %v1694_v24, %v1333_v34  ;;  %2407 = vmatmul.msk.f32.gmra.mxu2 %vm1773_vm9, %v1754_v9 }
 0x2de   : > { %v1760_v4 = vsel %vm1731_vm8, %v1727_v62, %v1461_v13 }
 0x2df   : > { %2413 = vmatmul.msk.f32.gmra.mxu3 %vm1773_vm9, %v1760_v4 }
 0x2e3   : > { %v1289_v18 = vpop.permute.xlu1 %1288 }
 0x2e4   : > { %v1173_v53 = vpop.permute.xlu0 %1172  ;;  %v1705_v57 = vsel %vm1698_vm7, %v3889_v32, %v1289_v18  ;;  %v1335_v32 = vpop.permute.xlu2 %1334 }
 0x2e5   : > { %v1738_v42 = vsel %vm1731_vm8, %v1705_v57, %v1417_v17  ;;  %v1678_v14 = vsel %vm1665_vm5, %v1645_v22, %v1173_v53 }
 0x2e6   : > { %2391 = vmatmul.msk.f32.gmra.mxu0 %vm1773_vm9, %v1738_v42  ;;  %v1711_v25 = vsel %vm1698_vm7, %v1678_v14, %v1301_v56  ;;  %v1891_v42 = vpop.f32.mrf.mxu0 }
 0x2eb   : > { %v1207_v35 = vpop.permute.xlu1 %1206 }
 0x2ec   : > { %v1195_v54 = vpop.permute.xlu0 %1194  ;;  %v1175_v7 = vpop.permute.xlu2 %1174  ;;  %v1695_v10 = vsel %vm1665_vm5, %v3810_v15, %v1207_v35 }
 0x2ed   : > { %v1689_v27 = vsel %vm1665_vm5, %v3730_v44, %v1195_v54  ;;  %v1728_v3 = vsel %vm1698_vm7, %v1695_v10, %v1335_v32  ;;  %v1679_v44 = vsel %vm1665_vm5, %v3634_v50, %v1175_v7  ;;  %v1892_v10 = vadd.f32 %v4247_v40, %v1891_v42 }
 0x2ee   : > { %v1894_v12 = vpop.f32.mrf.mxu0 }
 0x2f0   : > { %v4238_v59 = vpop.f32.mrf.mxu3 }
 0x2f3   : > { %v1323_v36 = vpop.permute.xlu1 %1322 }
 0x2f4   : > { %v1429_v49 = vpop.permute.xlu0 %1428  ;;  %v1722_v58 = vsel %vm1698_vm7, %v1689_v27, %v1323_v36  ;;  %v1209_v16 = vpop.permute.xlu2 %1208 }
 0x2f5   : > { %v1744_v20 = vsel %vm1731_vm8, %v1711_v25, %v1429_v49  ;;  %v1696_v29 = vsel %vm1665_vm5, %v3694_v33, %v1209_v16  ;;  %v1895_v25 = vadd.f32 %v4247_v40, %v1894_v12 }
 0x2f6   : > { %2397 = vmatmul.msk.f32.gmra.mxu1 %vm1773_vm9, %v1744_v20 }
 0x2fa   : > { %v4240_v63 = vpop.f32.mrf.mxu1 }
 0x2fb   : > { %v1463_v0 = vpop.permute.xlu1 %1462  ;;  %v1897_v35 = vpop.f32.mrf.mxu0 }
 0x2fc   : > { %v1451_v61 = vpop.permute.xlu0 %1450  ;;  %v1761_v52 = vsel %vm1731_vm8, %v1728_v3, %v1463_v0  ;;  %v1337_v21 = vpop.permute.xlu2 %1336  ;;  %v1898_v27 = vadd.f32 %v4247_v40, %v1897_v35 }
 0x2fd   : > { %v1755_v1 = vsel %vm1731_vm8, %v1722_v58, %v1451_v61  ;;  %2414 = vmatmul.msk.f32.gmra.mxu3 %vm1773_vm9, %v1761_v52  ;;  %v1729_v50 = vsel %vm1698_vm7, %v1696_v29, %v1337_v21 }
 0x2fe   : > { %2408 = vmatmul.msk.f32.gmra.mxu2 %vm1773_vm9, %v1755_v1  ;;  %v1988_v1 = vmax.f32 %v1895_v25, 0.0 }
 0x300   : > { %v2020_v29 = vsel %vm1731_vm8, %v1988_v1, 0.0 }
 0x303   : > { %v1303_v8 = vpop.permute.xlu1 %1302 }
 0x304   : > { %v1291_v15 = vpop.permute.xlu0 %1290  ;;  %v1712_v5 = vsel %vm1698_vm7, %v1679_v44, %v1303_v8  ;;  %v1305_v45 = vpop.permute.xlu2 %1304  ;;  %v1987_v44 = vmax.f32 %v1892_v10, 0.0  ;;  %v1916_v10 = vadd.f32 %v4247_v40, %v4240_v63 }
 0x305   : > { %v1706_v43 = vsel %vm1698_vm7, %v3807_v46, %v1291_v15 }
 0x30a   : > { %v4242_v32 = vpop.f32.mrf.mxu3 }
 0x30b   : > { %v1431_v47 = vpop.permute.xlu1 %1430  ;;  %v1900_v23 = vpop.f32.mrf.mxu0 }
 0x30c   : > { %v1419_v13 = vpop.permute.xlu0 %1418  ;;  %v1745_v26 = vsel %vm1731_vm8, %v1712_v5, %v1431_v47  ;;  %v1339_v33 = vpop.permute.xlu2 %1338  ;;  %v1901_v8 = vadd.f32 %v4247_v40, %v1900_v23  ;;  %v1989_v5 = vmax.f32 %v1898_v27, 0.0 }
 0x30d   : > { %v1739_v37 = vsel %vm1731_vm8, %v1706_v43, %v1419_v13  ;;  %2398 = vmatmul.msk.f32.gmra.mxu1 %vm1773_vm9, %v1745_v26 }
 0x30e   : > { %2392 = vmatmul.msk.f32.gmra.mxu0 %vm1773_vm9, %v1739_v37 }
 0x313   : > { %v1177_v41 = vpop.permute.xlu1 %1176 }
 0x314   : > { %v1465_v31 = vpop.permute.xlu0 %1464  ;;  %v1680_v60 = vsel %vm1665_vm5, %v3629_v2, %v1177_v41  ;;  %v4596_v2 = vld [vmem:[#allocation63_spill] sm:$0xff]  ;;  %v1307_v18 = vpop.permute.xlu2 %1306 }
 0x315   : > { %v1762_v46 = vsel %vm1731_vm8, %v1729_v50, %v1465_v31  ;;  %v1713_v51 = vsel %vm1698_vm7, %v1680_v60, %v1305_v45  ;;  %v1990_v31 = vmax.f32 %v1901_v8, 0.0 }
 0x316   : > { %2415 = vmatmul.msk.f32.gmra.mxu3 %vm1773_vm9, %v1762_v46 }
 0x31b   : > { %v1433_v11 = vpop.permute.xlu1 %1432  ;;  %v4249_v22 = vpop.f32.mrf.mxu1 }
 0x31c   : > { %v1211_v56 = vpop.permute.xlu0 %1210  ;;  %v1746_v24 = vsel %vm1731_vm8, %v1713_v51, %v1433_v11  ;;  %v2019_v51 = vsel %vm1731_vm8, %v1987_v44, 0.0 }
 0x31d   : > { %2399 = vmatmul.msk.f32.gmra.mxu1 %vm1773_vm9, %v1746_v24  ;;  %v1697_v28 = vsel %vm1665_vm5, %v3842_v38, %v1211_v56  ;;  %v1939_v38 = vpop.f32.mrf.mxu2  ;;  %v2022_v56 = vsel %vm1731_vm8, %v1989_v5, 0.0  ;;  %v1995_v5 = vmax.f32 %v1916_v10, 0.0 }
 0x31e   : > { %v1730_v34 = vsel %vm1698_vm7, %v1697_v28, %v1339_v33  ;;  %v1940_v49 = vadd.f32 %v4247_v40, %v1939_v38 }
 0x320   : > { %v2003_v3 = vmax.f32 %v1940_v49, 0.0 }
 0x322   : > { %v2056_v26 = vsel %vm1731_vm8, %v2003_v3, 0.0 }
 0x323   : > { %v1179_v9 = vpop.permute.xlu1 %1178 }
 0x324   : > { %v1467_v48 = vpop.permute.xlu0 %1466  ;;  %v1681_v4 = vsel %vm1665_vm5, %v4596_v2, %v1179_v9  ;;  %v2021_v9 = vadd.f32 %v2020_v29, %v2019_v51  ;;  %v2034_v29 = vsel %vm1731_vm8, %v1995_v5, 0.0 }
 0x325   : > { %v1763_v62 = vsel %vm1731_vm8, %v1730_v34, %v1467_v48  ;;  %v1714_v53 = vsel %vm1698_vm7, %v1681_v4, %v1307_v18  ;;  %v1942_v39 = vpop.f32.mrf.mxu2  ;;  %v2024_v18 = vsel %vm1731_vm8, %v1990_v31, 0.0 }
 0x326   : > { %2416 = vmatmul.msk.f32.gmra.mxu3 %vm1773_vm9, %v1763_v62  ;;  %v1943_v36 = vadd.f32 %v4247_v40, %v1942_v39  ;;  %v2023_v38 = vadd.f32 %v2022_v56, %v2021_v9 }
 0x328   : > { %v4257_v58 = vpop.f32.mrf.mxu3  ;;  %v2004_v0 = vmax.f32 %v1943_v36, 0.0 }
 0x32a   : > { %v2057_v13 = vsel %vm1731_vm8, %v2004_v0, 0.0 }
 0x32b   : > { %v4260_v16 = vpop.f32.mrf.mxu1  ;;  %v2058_v11 = vadd.f32 %v2057_v13, %v2056_v26 }
 0x32c   : > { %v1435_v17 = vpop.permute.xlu0 %1434 }
 0x32d   : > { %v1747_v57 = vsel %vm1731_vm8, %v1714_v53, %v1435_v17  ;;  %v1945_v19 = vpop.f32.mrf.mxu2 }
 0x32e   : > { %2400 = vmatmul.msk.f32.gmra.mxu1 %vm1773_vm9, %v1747_v57  ;;  %v1946_v20 = vadd.f32 %v4247_v40, %v1945_v19 }
 0x330   : > { %v2005_v52 = vmax.f32 %v1946_v20, 0.0 }
 0x332   : > { %v1903_v30 = vpop.f32.mrf.mxu0  ;;  %v2059_v50 = vsel %vm1731_vm8, %v2005_v52, 0.0 }
 0x333   : > { %v1904_v43 = vadd.f32 %v4247_v40, %v1903_v30  ;;  %v2060_v2 = vadd.f32 %v2059_v50, %v2058_v11  ;;  %v1922_v50 = vadd.f32 %v4247_v40, %v4260_v16 }
 0x335   : > { %v1948_v54 = vpop.f32.mrf.mxu2  ;;  %v1991_v24 = vmax.f32 %v1904_v43, 0.0  ;;  %v1919_v43 = vadd.f32 %v4247_v40, %v4249_v22  ;;  %v1997_v11 = vmax.f32 %v1922_v50, 0.0 }
 0x336   : > { %v1949_v61 = vadd.f32 %v4247_v40, %v1948_v54 }
 0x337   : > { %v2026_v39 = vsel %vm1731_vm8, %v1991_v24, 0.0 }
 0x338   : > { %v2006_v21 = vmax.f32 %v1949_v61, 0.0 }
 0x33a   : > { %v2061_v28 = vsel %vm1731_vm8, %v2006_v21, 0.0  ;;  %v1970_v21 = vadd.f32 %v4247_v40, %v4257_v58 }
 0x33b   : > { %v2062_v42 = vadd.f32 %v2061_v28, %v2060_v2 }
 0x33c   : > { %v2013_v22 = vmax.f32 %v1970_v21, 0.0 }
 0x33d   : > { %v1951_v55 = vpop.f32.mrf.mxu2 }
 0x33e   : > { %v1952_v15 = vadd.f32 %v4247_v40, %v1951_v55  ;;  %v2025_v55 = vadd.f32 %v2024_v18, %v2023_v38  ;;  %v2075_v24 = vsel %vm1731_vm8, %v2013_v22, 0.0 }
 0x340   : > { %v2007_v45 = vmax.f32 %v1952_v15, 0.0  ;;  %v2027_v25 = vadd.f32 %v2026_v39, %v2025_v55 }
 0x342   : > { %v2063_v53 = vsel %vm1731_vm8, %v2007_v45, 0.0 }
 0x343   : > { %v2064_v30 = vadd.f32 %v2063_v53, %v2062_v42 }
 0x345   : > { %v1954_v6 = vpop.f32.mrf.mxu2 }
 0x346   : > { %v1955_v37 = vadd.f32 %v4247_v40, %v1954_v6  ;;  %v1964_v6 = vadd.f32 %v4247_v40, %v4238_v59  ;;  %v1967_v59 = vadd.f32 %v4247_v40, %v4242_v32  ;;  %v1996_v32 = vmax.f32 %v1919_v43, 0.0 }
 0x348   : > { %v2008_v34 = vmax.f32 %v1955_v37, 0.0  ;;  %v2011_v52 = vmax.f32 %v1964_v6, 0.0  ;;  %v2012_v13 = vmax.f32 %v1967_v59, 0.0  ;;  %v2036_v51 = vsel %vm1731_vm8, %v1996_v32, 0.0 }
 0x349   : > { %v1972_v33 = vpop.f32.mrf.mxu3 }
 0x34a   : > { %v2065_v19 = vsel %vm1731_vm8, %v2008_v34, 0.0  ;;  %v2073_v45 = vsel %vm1731_vm8, %v2012_v13, 0.0 }
 0x34b   : > { %v2066_v20 = vadd.f32 %v2065_v19, %v2064_v30 }
 0x352   : > { %v1924_v4 = vpop.f32.mrf.mxu1 }
 0x353   : > { %v1906_v14 = vpop.f32.mrf.mxu0  ;;  %v1925_v58 = vadd.f32 %v4247_v40, %v1924_v4 }
 0x354   : > { %v1907_v46 = vadd.f32 %v4247_v40, %v1906_v14 }
 0x355   : > { %v1998_v9 = vmax.f32 %v1925_v58, 0.0 }
 0x356   : > { %v1992_v17 = vmax.f32 %v1907_v46, 0.0  ;;  %v1973_v46 = vadd.f32 %v4247_v40, %v1972_v33 }
 0x357   : > { %v2040_v42 = vsel %vm1731_vm8, %v1998_v9, 0.0 }
 0x358   : > { %v2028_v14 = vsel %vm1731_vm8, %v1992_v17, 0.0  ;;  %v2014_v28 = vmax.f32 %v1973_v46, 0.0 }
 0x359   : > { %v2029_v61 = vadd.f32 %v2028_v14, %v2027_v25 }
 0x35a   : > { %v2077_v53 = vsel %vm1731_vm8, %v2014_v28, 0.0 }
 0x360   : > { %v1957_v7 = vpop.f32.mrf.mxu2 }
 0x361   : > { %v1958_v60 = vadd.f32 %v4247_v40, %v1957_v7 }
 0x362   : > { %v1975_v7 = vpop.f32.mrf.mxu3 }
 0x363   : > { %v1909_v47 = vpop.f32.mrf.mxu0  ;;  %v2009_v57 = vmax.f32 %v1958_v60, 0.0  ;;  %v1976_v34 = vadd.f32 %v4247_v40, %v1975_v7 }
 0x364   : > { %v1910_v48 = vadd.f32 %v4247_v40, %v1909_v47  ;;  %v2071_v47 = vsel %vm1731_vm8, %v2011_v52, 0.0 }
 0x365   : > { %v2067_v36 = vsel %vm1731_vm8, %v2009_v57, 0.0  ;;  %v2015_v17 = vmax.f32 %v1976_v34, 0.0 }
 0x366   : > { %v1993_v35 = vmax.f32 %v1910_v48, 0.0  ;;  %v2068_v3 = vadd.f32 %v2067_v36, %v2066_v20 }
 0x368   : > { %v2030_v27 = vsel %vm1731_vm8, %v1993_v35, 0.0 }
 0x369   : > { %v2031_v15 = vadd.f32 %v2030_v27, %v2029_v61 }
 0x373   : > { %v1927_v1 = vpop.f32.mrf.mxu1 }
 0x374   : > { %v1928_v2 = vadd.f32 %v4247_v40, %v1927_v1 }
 0x376   : > { %v1999_v39 = vmax.f32 %v1928_v2, 0.0 }
 0x378   : > { %v2042_v6 = vsel %vm1731_vm8, %v1999_v39, 0.0 }
 0x380   : > { %v1978_v26 = vpop.f32.mrf.mxu3 }
 0x381   : > { %v1960_v41 = vpop.f32.mrf.mxu2  ;;  %v1979_v4 = vadd.f32 %v4247_v40, %v1978_v26 }
 0x382   : > { %v1961_v62 = vadd.f32 %v4247_v40, %v1960_v41 }
 0x384   : > { %v2010_v54 = vmax.f32 %v1961_v62, 0.0  ;;  %v2038_v62 = vsel %vm1731_vm8, %v1997_v11, 0.0 }
 0x386   : > { %v2069_v0 = vsel %vm1731_vm8, %v2010_v54, 0.0  ;;  %v2079_v54 = vsel %vm1731_vm8, %v2015_v17, 0.0 }
 0x387   : > { %v2070_v44 = vadd.f32 %v2069_v0, %v2068_v3 }
 0x389   : > { %v2072_v37 = vadd.f32 %v2071_v47, %v2070_v44 }
 0x38a   : > { %v1930_v31 = vpop.f32.mrf.mxu1 }
 0x38b   : > { %v1912_v12 = vpop.f32.mrf.mxu0  ;;  %v2074_v60 = vadd.f32 %v2073_v45, %v2072_v37 }
 0x38c   : > { %v1913_v23 = vadd.f32 %v4247_v40, %v1912_v12  ;;  %v1931_v12 = vadd.f32 %v4247_v40, %v1930_v31 }
 0x38d   : > { %v2076_v16 = vadd.f32 %v2075_v24, %v2074_v60 }
 0x38e   : > { %v1994_v49 = vmax.f32 %v1913_v23, 0.0  ;;  %v2016_v23 = vmax.f32 %v1979_v4, 0.0  ;;  %v2000_v14 = vmax.f32 %v1931_v12, 0.0 }
 0x38f   : > { %v2078_v38 = vadd.f32 %v2077_v53, %v2076_v16 }
 0x390   : > { %v2032_v8 = vsel %vm1731_vm8, %v1994_v49, 0.0  ;;  %v2081_v20 = vsel %vm1731_vm8, %v2016_v23, 0.0  ;;  %v2044_v61 = vsel %vm1731_vm8, %v2000_v14, 0.0 }
 0x391   : > { %v2033_v63 = vadd.f32 %v2032_v8, %v2031_v15  ;;  %v2080_v30 = vadd.f32 %v2079_v54, %v2078_v38 }
 0x393   : > { %v2035_v41 = vadd.f32 %v2034_v29, %v2033_v63  ;;  %v2082_v27 = vadd.f32 %v2081_v20, %v2080_v30 }
 0x395   : > { %v2037_v56 = vadd.f32 %v2036_v51, %v2035_v41 }
 0x397   : > { %v2039_v33 = vadd.f32 %v2038_v62, %v2037_v56 }
 0x399   : > { %v1981_v48 = vpop.f32.mrf.mxu3  ;;  %v2041_v35 = vadd.f32 %v2040_v42, %v2039_v33 }
 0x39a   : > { %v1933_v18 = vpop.f32.mrf.mxu1  ;;  %v1982_v57 = vadd.f32 %v4247_v40, %v1981_v48 }
 0x39b   : > { %v1934_v19 = vadd.f32 %v4247_v40, %v1933_v18  ;;  %v2043_v49 = vadd.f32 %v2042_v6, %v2041_v35 }
 0x39c   : > { %v2017_v55 = vmax.f32 %v1982_v57, 0.0 }
 0x39d   : > { %v2001_v36 = vmax.f32 %v1934_v19, 0.0  ;;  %v2045_v59 = vadd.f32 %v2044_v61, %v2043_v49 }
 0x39e   : > { %v2083_v7 = vsel %vm1731_vm8, %v2017_v55, 0.0 }
 0x39f   : > { %v2046_v3 = vsel %vm1731_vm8, %v2001_v36, 0.0  ;;  %v2084_v8 = vadd.f32 %v2083_v7, %v2082_v27 }
 0x3a0   : > { %v2047_v5 = vadd.f32 %v2046_v3, %v2045_v59 }
 0x3a9   : > { %v1984_v25 = vpop.f32.mrf.mxu3 }
 0x3aa   : > { %v1985_v10 = vadd.f32 %v4247_v40, %v1984_v25 }
 0x3ab   : > { %v1936_v0 = vpop.f32.mrf.mxu1 }
 0x3ac   : > { %v2018_v1 = vmax.f32 %v1985_v10, 0.0  ;;  %v1937_v52 = vadd.f32 %v4247_v40, %v1936_v0 }
 0x3ae   : > { %v2085_v15 = vsel %vm1731_vm8, %v2018_v1, 0.0  ;;  %v2002_v44 = vmax.f32 %v1937_v52, 0.0 }
 0x3af   : > { %v2086_v43 = vadd.f32 %v2085_v15, %v2084_v8 }
 0x3b0   : > { %v2048_v63 = vsel %vm1731_vm8, %v2002_v44, 0.0 }
 0x3b1   : > { %v2087_v47 = vrot.slane %v2086_v43, 4  ;;  %v2049_v13 = vadd.f32 %v2048_v63, %v2047_v5 }
 0x3b3   : > { %v2088_v21 = vadd.f32 %v2087_v47, %v2086_v43  ;;  %v2050_v37 = vrot.slane %v2049_v13, 4 }
 0x3b5   : > { %v2089_v26 = vrot.slane %v2088_v21, 2  ;;  %v2051_v29 = vadd.f32 %v2050_v37, %v2049_v13 }
 0x3b7   : > { %v2090_v32 = vadd.f32 %v2089_v26, %v2088_v21  ;;  %v2052_v50 = vrot.slane %v2051_v29, 2 }
 0x3b9   : > { %v2091_v41 = vrot.slane %v2090_v32, 1  ;;  %v2053_v31 = vadd.f32 %v2052_v50, %v2051_v29  ;;  %2096 = sbr.rel (%p2417_p4) target bundleno = 960 (0x3c0), region = 36 }
 0x3bb   : > { %v2092_v40 = vadd.f32 %v2091_v41, %v2090_v32  ;;  %v2054_v45 = vrot.slane %v2053_v31, 1 }
 0x3bd   : > { %v2055_v22 = vadd.f32 %v2054_v45, %v2053_v31 }
 0x3be   : > { %vm2097_vm10 = vcmask 254976   ;;  %v2550_v46 = vmov 0.0  }
 0x3bf   : > { %2098 = vst.msk [vmem:[#allocation2] sm:$0x3] %vm2097_vm10, %v2550_v46 }
 0x3c0 PF: > { %vm2102_vm11 = vcmask 1041409   ;;  %p2441_p5 = scmp.eq.s32.totalorder %s2182_s15, 1  ;;  %vm2106_vm12 = vcmask 254976   ;;  %s2118_s21 = sshll.u32 %s4343_s3, 4  ;;  %s2119_s21 = int_to_ptr.hbm [resolvable:$true] %s2118_s21 }
 0x3c1   : > { %v2103_v51 = vsel %vm2102_vm11, %v2092_v40, %v2055_v22  ;;  %s2551_s22 = smov [#allocation2]  }
 0x3c2   : > { %s2116_s23 = sshll.u32 %s2551_s22, 4  ;;  %s2117_s23 = int_to_ptr.vmem [resolvable:$true] %s2116_s23 }
 0x3c6   : > { %v2099_v60 = vld [vmem:[#allocation2] sm:$0x3] }
 0x3c7   : > { %v2105_v11 = vadd.f32 %v2103_v51, %v2099_v60 }
 0x3c9   : > { %2107 = vst.msk [vmem:[#allocation2] sm:$0x3] %vm2106_vm12, %v2105_v11 }
 0x3ca   : > { %2438 = dma.vmem_to_hbm [thread:$0]  (%p2441_p5), %s2117_s23, 32, %s2119_s21, [#allocation3]  }
 0x3cb   : > { %2527 = dma.done.wait (%p2441_p5), [#allocation3], 32  }
 0x3cc   : > { %2529 = vsyncadd (%p2441_p5), [#allocation3], 4294967264 }
 0x3cd PF: > { %s14_s14 = sadd.s32 1, %s2540_s14   ;;  %s4597_s12 = smov %s2536_s13 }
 0x3ce   : > { %p11_p6 = scmp.ge.s32.totalorder %s14_s14, 4   ;;  %s4598_s13 = smov %s4600_s16 }
 0x3d0   :  { %13 = sbr.rel (!%p11_p6) target bundleno = 2 (0x2), region = 67 }
 0x3d5   :  { %2132 = vsyncpa [#allocation3], 1 }
 0x3d6   :  { %2134 = vsyncpa [#allocation3 + $0x1], 1 }

</bundles_post_ra>
